<compile_context>
chip_gen: v6e
topology: v6e:2x2x1
jax: 0.10.0
libtpu: 0.0.40
codegen_flags: <defaults>
</compile_context>

<pallas_src>
import functools

import jax
import jax.numpy as jnp
from jax.experimental import pallas as pl
from jax.experimental.pallas import tpu as pltpu


def _layer_norm(x, gamma, beta, eps=1e-5):
    # PyTorch LayerNorm semantics (fp32 compute, eps=1e-5); centered statistics
    # (more robust than E[x^2]-E[x]^2 for large-magnitude activations).
    xf = x.astype(jnp.float32)
    mean = jnp.mean(xf, axis=-1, keepdims=True)
    c = xf - mean
    var = jnp.mean(c * c, axis=-1, keepdims=True)
    return c * jax.lax.rsqrt(var + eps) * gamma + beta


def _weight_spec(p):
    # Whole-array resident weight: constant index_map -> single buffer is enough.
    nd = p.ndim
    return pl.BlockSpec(p.shape, lambda *_, nd=nd: (0,) * nd,
                        pipeline_mode=pl.Buffered(1))


def _vmem_limit_bytes(frac=0.8, fallback=48 * 1024 * 1024):
    try:
        return int(pltpu.get_tpu_info().vmem_capacity_bytes * frac)
    except Exception:  # non-TPU backend / older jax
        return fallback


# --------------------------------------------------------------------------- #
# Pass 1: LN1 + K/V projection (K written pre-transposed).
# --------------------------------------------------------------------------- #
def kv_proj_kernel(x_ref, ln1_g_ref, ln1_b_ref, wkv_ref, bkv_ref,
                   k_ref, v_ref, *, n_head):
    H = n_head
    tk, E = x_ref.shape
    Dh = E // H
    ln1 = _layer_norm(x_ref[...], ln1_g_ref[...], ln1_b_ref[...])
    kv = (jnp.dot(ln1.astype(jnp.bfloat16), wkv_ref[...],
                  preferred_element_type=jnp.float32) + bkv_ref[...])     # (tk, 2E)
    # K stored as (H, Dh, tk): the transpose is paid once here rather than on
    # every query tile of the attention pass.
    for h in range(H):
        k_ref[h] = jnp.transpose(kv[:, h * Dh:(h + 1) * Dh]).astype(jnp.bfloat16)
        v_ref[h] = kv[:, E + h * Dh:E + (h + 1) * Dh].astype(jnp.bfloat16)


# --------------------------------------------------------------------------- #
# Pass 2: attention + MLP (+ adapters) for one query tile.
# --------------------------------------------------------------------------- #
def attn_mlp_kernel(x_ref, k_ref, v_ref,
                    ln1_g_ref, ln1_b_ref, wq_ref, bq_ref, wo_ref, bo_ref,
                    ln2_g_ref, ln2_b_ref, wfc_ref, bfc_ref, wproj_ref, bproj_ref,
                    *rest, n_head, seq_len, adptr):
    if adptr:
        (wa1_ref, ba1_ref, wa2_ref, ba2_ref,
         wm1_ref, bm1_ref, wm2_ref, bm2_ref, out_ref) = rest
    else:
        (out_ref,) = rest

    H = n_head
    tq, E = x_ref.shape
    Dh = E // H
    Lp = k_ref.shape[-1]

    x = x_ref[...].astype(jnp.float32)                                     # (tq, E)

    # ---- attention branch -------------------------------------------------
    ln1 = _layer_norm(x, ln1_g_ref[...], ln1_b_ref[...])
    # 1/sqrt(Dh) already folded into wq / bq host-side.
    q = (jnp.dot(ln1.astype(jnp.bfloat16), wq_ref[...],
                 preferred_element_type=jnp.float32) + bq_ref[...])        # (tq, E)
    q_bf = q.astype(jnp.bfloat16)

    key_mask = None
    if seq_len < Lp:   # padded key positions must not contribute to softmax
        key_mask = jax.lax.broadcasted_iota(jnp.int32, (tq, Lp), 1) < seq_len

    attn = jnp.zeros((tq, E), jnp.float32)
    for h in range(H):   # static per-head loop: no head scratch / masked column stores
        s = jnp.dot(q_bf[:, h * Dh:(h + 1) * Dh], k_ref[h],
                    preferred_element_type=jnp.float32)                    # (tq, Lp)
        if key_mask is not None:
            s = jnp.where(key_mask, s, -1e30)
        m = jnp.max(s, axis=-1, keepdims=True)
        p = jnp.exp(s - m)
        denom = jnp.sum(p, axis=-1, keepdims=True)
        o_h = jnp.dot(p.astype(jnp.bfloat16), v_ref[h],
                      preferred_element_type=jnp.float32)                  # (tq, Dh)
        o_h = o_h * pl.reciprocal(denom, approx=True)   # fold 1/denom into small tensor
        # Accumulating per-head output projection: attn += o_h @ Wo[h*Dh:(h+1)*Dh, :]
        attn = attn + jnp.dot(o_h.astype(jnp.bfloat16), wo_ref[h],
                              preferred_element_type=jnp.float32)
    attn = attn + bo_ref[...]

    if adptr:
        a = (jnp.dot(attn.astype(jnp.bfloat16), wa1_ref[...],
                     preferred_element_type=jnp.float32) + ba1_ref[...])
        a = jnp.maximum(a, 0.0)
        attn = attn + (jnp.dot(a.astype(jnp.bfloat16), wa2_ref[...],
                               preferred_element_type=jnp.float32) + ba2_ref[...])

    x = x + attn

    # ---- MLP branch --------------------------------------------------------
    ln2 = _layer_norm(x, ln2_g_ref[...], ln2_b_ref[...])
    hmid = (jnp.dot(ln2.astype(jnp.bfloat16), wfc_ref[...],
                    preferred_element_type=jnp.float32) + bfc_ref[...])
    hmid = hmid * jax.nn.sigmoid(1.702 * hmid)                             # QuickGELU
    mlp = (jnp.dot(hmid.astype(jnp.bfloat16), wproj_ref[...],
                   preferred_element_type=jnp.float32) + bproj_ref[...])

    if adptr:
        a = (jnp.dot(mlp.astype(jnp.bfloat16), wm1_ref[...],
                     preferred_element_type=jnp.float32) + bm1_ref[...])
        a = jnp.maximum(a, 0.0)
        mlp = mlp + (jnp.dot(a.astype(jnp.bfloat16), wm2_ref[...],
                             preferred_element_type=jnp.float32) + bm2_ref[...])

    out_ref[...] = (x + mlp).astype(out_ref.dtype)


# --------------------------------------------------------------------------- #
# Wrappers
# --------------------------------------------------------------------------- #
def resblock_apply(x, layer, n_head, seq_len, adptr, tq, vmem_limit):
    N, Lp, E = x.shape
    H = n_head
    Dh = E // H
    T = Lp // tq

    (ln1_g, ln1_b, wq, bq, wkv, bkv, wo3, bo,
     ln2_g, ln2_b, wfc, bfc, wproj, bproj) = layer[:14]
    adapters = list(layer[14:]) if adptr else []

    compiler_params = pltpu.CompilerParams(
        dimension_semantics=("parallel", "parallel"),
        vmem_limit_bytes=vmem_limit)

    # ---- pass 1: K/V projection, K stored pre-transposed -------------------
    kv_kernel = functools.partial(kv_proj_kernel, n_head=n_head)
    k, v = pl.pallas_call(
        kv_kernel,
        out_shape=(jax.ShapeDtypeStruct((N, H, Dh, Lp), jnp.bfloat16),
                   jax.ShapeDtypeStruct((N, H, Lp, Dh), jnp.bfloat16)),
        grid=(N, T),
        in_specs=[pl.BlockSpec((None, tq, E), lambda b, t: (b, t, 0))]
                 + [_weight_spec(p) for p in (ln1_g, ln1_b, wkv, bkv)],
        out_specs=(pl.BlockSpec((None, H, Dh, tq), lambda b, t: (b, 0, 0, t)),
                   pl.BlockSpec((None, H, tq, Dh), lambda b, t: (b, 0, t, 0))),
        compiler_params=compiler_params,
    )(x, ln1_g, ln1_b, wkv, bkv)

    # ---- pass 2: attention + MLP per query tile -----------------------------
    p2_weights = [ln1_g, ln1_b, wq, bq, wo3, bo,
                  ln2_g, ln2_b, wfc, bfc, wproj, bproj] + adapters
    attn_kernel = functools.partial(attn_mlp_kernel, n_head=n_head,
                                    seq_len=seq_len, adptr=adptr)
    return pl.pallas_call(
        attn_kernel,
        out_shape=jax.ShapeDtypeStruct((N, Lp, E), x.dtype),
        grid=(N, T),
        in_specs=[pl.BlockSpec((None, tq, E), lambda b, t: (b, t, 0)),
                  pl.BlockSpec((None, H, Dh, Lp), lambda b, t: (b, 0, 0, 0)),
                  pl.BlockSpec((None, H, Lp, Dh), lambda b, t: (b, 0, 0, 0))]
                 + [_weight_spec(p) for p in p2_weights],
        out_specs=pl.BlockSpec((None, tq, E), lambda b, t: (b, t, 0)),
        compiler_params=compiler_params,
    )(x, k, v, *p2_weights)


def transformer_forward(x, params, n_head, adptr=False, tq=None):
    """params: list (one entry per layer) of flat lists of arrays in kernel order."""
    N, L, E = x.shape
    Lp = ((L + 127) // 128) * 128            # pad seq to a multiple of 128
    if tq is None:
        tq = 256 if Lp % 256 == 0 else 128   # larger M amortizes the short-Dh MXU fill
    tq = min(tq, Lp)
    assert Lp % tq == 0, "query-tile size must divide the padded sequence length"

    xp = x if Lp == L else jnp.pad(x, ((0, 0), (0, Lp - L), (0, 0)))
    vmem_limit = _vmem_limit_bytes()
    for layer in params:
        xp = resblock_apply(xp, layer, n_head=n_head, seq_len=L, adptr=adptr,
                            tq=tq, vmem_limit=vmem_limit)
    return xp if Lp == L else xp[:, :L, :]


def init_params(key, width, layers, n_head, adptr=False):
    """Kernel-ready parameters: weights pre-transposed to (in, out), Q scale folded
    into Wq/bq, out_proj reshaped to (H, Dh, E), matmul weights in bf16."""
    E = width
    H = n_head
    Dh = E // H
    scale = 1.0 / (Dh ** 0.5)
    wdt = jnp.bfloat16
    params = []
    for _ in range(layers):
        keys = jax.random.split(key, 9)
        key = keys[-1]
        std = 0.02
        wqkv = jax.random.normal(keys[0], (E, 3 * E), jnp.float32) * std   # (in, out)
        bqkv = jnp.zeros((1, 3 * E), jnp.float32)
        wq = (wqkv[:, :E] * scale).astype(wdt)       # fold 1/sqrt(Dh) into Wq
        bq = bqkv[:, :E] * scale                     # ... and into bq
        wkv = wqkv[:, E:].astype(wdt)
        bkv = bqkv[:, E:]
        wo3 = (jax.random.normal(keys[1], (E, E), jnp.float32) * std
               ).reshape(H, Dh, E).astype(wdt)       # out_proj split per head
        layer = [
            jnp.ones((1, E), jnp.float32),                                   # ln1 gamma
            jnp.zeros((1, E), jnp.float32),                                  # ln1 beta
            wq, bq, wkv, bkv,                                                # in_proj (split)
            wo3, jnp.zeros((1, E), jnp.float32),                             # out_proj
            jnp.ones((1, E), jnp.float32),                                   # ln2 gamma
            jnp.zeros((1, E), jnp.float32),                                  # ln2 beta
            (jax.random.normal(keys[2], (E, 4 * E), jnp.float32) * std).astype(wdt),  # c_fc W
            jnp.zeros((1, 4 * E), jnp.float32),                              # c_fc b
            (jax.random.normal(keys[3], (4 * E, E), jnp.float32) * std).astype(wdt),  # c_proj W
            jnp.zeros((1, E), jnp.float32),                                  # c_proj b
        ]
        if adptr:
            astd = 0.001  # matches init_adptr (normal std=0.001, zero bias)
            layer += [
                (jax.random.normal(keys[4], (E, E // 2), jnp.float32) * astd).astype(wdt),
                jnp.zeros((1, E // 2), jnp.float32),
                (jax.random.normal(keys[5], (E // 2, E), jnp.float32) * astd).astype(wdt),
                jnp.zeros((1, E), jnp.float32),
                (jax.random.normal(keys[6], (E, E // 2), jnp.float32) * astd).astype(wdt),
                jnp.zeros((1, E // 2), jnp.float32),
                (jax.random.normal(keys[7], (E // 2, E), jnp.float32) * astd).astype(wdt),
                jnp.zeros((1, E), jnp.float32),
            ]
        params.append(layer)
    return params


if __name__ == "__main__":
    # Small shapes: batch N=2, seq L=200 (padded to 256 -> two 128-row query tiles,
    # padded-key masking exercised), width E=32, heads=4, layers=2.
    # attn_mask=None and adptr=False (the module defaults).
    # TODO(synk): non-None attn_mask / key_padding_mask path is not implemented.
    N, L, E, H, LAYERS = 2, 200, 32, 4, 2
    ADPTR = False
    TQ = 128

    key = jax.random.PRNGKey(0)
    kx, kp = jax.random.split(key)
    x = jax.random.normal(kx, (N, L, E), jnp.float32)   # layout: (batch, seq, width)
    params = init_params(kp, E, LAYERS, n_head=H, adptr=ADPTR)

    out = transformer_forward(x, params, n_head=H, adptr=ADPTR, tq=TQ)
    jax.block_until_ready(out)
    assert out.shape == (N, L, E)
    print("KERNEL_OK")
</pallas_src>

<mosaic_0001>
module attributes {stable_mosaic.version = 11 : i64} {
  func.func @kv_proj_kernel(%arg0: i32, %arg1: i32, %arg2: memref<1x128x32xf32, #tpu.memory_space<vmem>>, %arg3: memref<1x32xf32, #tpu.memory_space<vmem>>, %arg4: memref<1x32xf32, #tpu.memory_space<vmem>>, %arg5: memref<32x64xbf16, #tpu.memory_space<vmem>>, %arg6: memref<1x64xf32, #tpu.memory_space<vmem>>, %arg7: memref<1x4x8x128xbf16, #tpu.memory_space<vmem>>, %arg8: memref<1x4x128x8xbf16, #tpu.memory_space<vmem>>) attributes {dimension_semantics = [#tpu.dimension_semantics<parallel>, #tpu.dimension_semantics<parallel>], iteration_bounds = array<i64: 2, 2>, scalar_prefetch = 0 : i64, scratch_operands = 0 : i64, tpu.core_type = #tpu.core_type<tc>, window_params = [{transform_indices = @transform_0, window_bounds = array<i64: 1, 128, 32>}, {pipeline_mode = #tpu.pipeline_mode<synchronous>, transform_indices = @transform_1, window_bounds = array<i64: 1, 32>}, {pipeline_mode = #tpu.pipeline_mode<synchronous>, transform_indices = @transform_2, window_bounds = array<i64: 1, 32>}, {pipeline_mode = #tpu.pipeline_mode<synchronous>, transform_indices = @transform_3, window_bounds = array<i64: 32, 64>}, {pipeline_mode = #tpu.pipeline_mode<synchronous>, transform_indices = @transform_4, window_bounds = array<i64: 1, 64>}, {transform_indices = @transform_5, window_bounds = array<i64: 1, 4, 8, 128>}, {transform_indices = @transform_6, window_bounds = array<i64: 1, 4, 128, 8>}]} {
    %c0 = arith.constant 0 : index
    %c0_0 = arith.constant 0 : index
    %c0_1 = arith.constant 0 : index
    %0 = vector.load %arg2[%c0, %c0_0, %c0_1] : memref<1x128x32xf32, #tpu.memory_space<vmem>>, vector<1x128x32xf32>
    %1 = vector.shape_cast %0 : vector<1x128x32xf32> to vector<128x32xf32>
    %c0_2 = arith.constant 0 : index
    %c0_3 = arith.constant 0 : index
    %2 = vector.load %arg3[%c0_2, %c0_3] : memref<1x32xf32, #tpu.memory_space<vmem>>, vector<1x32xf32>
    %c0_4 = arith.constant 0 : index
    %c0_5 = arith.constant 0 : index
    %3 = vector.load %arg4[%c0_4, %c0_5] : memref<1x32xf32, #tpu.memory_space<vmem>>, vector<1x32xf32>
    %cst = arith.constant dense<0.000000e+00> : vector<128xf32>
    %4 = vector.multi_reduction <add>, %1, %cst [1] : vector<128x32xf32> to vector<128xf32>
    %5 = vector.shape_cast %4 : vector<128xf32> to vector<128x1xf32>
    %cst_6 = arith.constant 3.200000e+01 : f32
    %6 = vector.broadcast %cst_6 : f32 to vector<128x1xf32>
    %7 = arith.divf %5, %6 : vector<128x1xf32>
    %8 = vector.broadcast %7 : vector<128x1xf32> to vector<128x32xf32>
    %9 = arith.subf %1, %8 : vector<128x32xf32>
    %10 = arith.mulf %9, %9 : vector<128x32xf32>
    %cst_7 = arith.constant dense<0.000000e+00> : vector<128xf32>
    %11 = vector.multi_reduction <add>, %10, %cst_7 [1] : vector<128x32xf32> to vector<128xf32>
    %12 = vector.shape_cast %11 : vector<128xf32> to vector<128x1xf32>
    %cst_8 = arith.constant 3.200000e+01 : f32
    %13 = vector.broadcast %cst_8 : f32 to vector<128x1xf32>
    %14 = arith.divf %12, %13 : vector<128x1xf32>
    %cst_9 = arith.constant 9.99999974E-6 : f32
    %15 = vector.broadcast %cst_9 : f32 to vector<128x1xf32>
    %16 = arith.addf %14, %15 : vector<128x1xf32>
    %17 = math.rsqrt %16 : vector<128x1xf32>
    %18 = vector.broadcast %17 : vector<128x1xf32> to vector<128x32xf32>
    %19 = arith.mulf %9, %18 : vector<128x32xf32>
    %20 = vector.broadcast %2 : vector<1x32xf32> to vector<128x32xf32>
    %21 = arith.mulf %19, %20 : vector<128x32xf32>
    %22 = vector.broadcast %3 : vector<1x32xf32> to vector<128x32xf32>
    %23 = arith.addf %21, %22 : vector<128x32xf32>
    %24 = arith.truncf %23 : vector<128x32xf32> to vector<128x32xbf16>
    %c0_10 = arith.constant 0 : index
    %c0_11 = arith.constant 0 : index
    %25 = vector.load %arg5[%c0_10, %c0_11] : memref<32x64xbf16, #tpu.memory_space<vmem>>, vector<32x64xbf16>
    %cst_12 = arith.constant dense<0.000000e+00> : vector<128x64xf32>
    %26 = tpu.matmul %24, %25, %cst_12 {dimension_numbers = #tpu.dot_dimension_numbers<[1], [0], [0], [1], [0, 0, 1, 1], [], []>} : vector<128x32xbf16>, vector<32x64xbf16>, vector<128x64xf32> -> vector<128x64xf32>
    %c0_13 = arith.constant 0 : index
    %c0_14 = arith.constant 0 : index
    %27 = vector.load %arg6[%c0_13, %c0_14] : memref<1x64xf32, #tpu.memory_space<vmem>>, vector<1x64xf32>
    %28 = vector.broadcast %27 : vector<1x64xf32> to vector<128x64xf32>
    %29 = arith.addf %26, %28 : vector<128x64xf32>
    %30 = vector.extract_strided_slice %29 {offsets = [0, 0], sizes = [128, 8], strides = [1, 1]} : vector<128x64xf32> to vector<128x8xf32>
    %31 = tpu.transpose %30, [1, 0] : vector<128x8xf32> -> vector<8x128xf32>
    %32 = arith.truncf %31 : vector<8x128xf32> to vector<8x128xbf16>
    %c0_15 = arith.constant 0 : index
    %c0_16 = arith.constant 0 : index
    %c0_17 = arith.constant 0 : index
    %c0_18 = arith.constant 0 : index
    %33 = vector.load %arg7[%c0_15, %c0_16, %c0_17, %c0_18] : memref<1x4x8x128xbf16, #tpu.memory_space<vmem>>, vector<1x1x8x128xbf16>
    %34 = vector.shape_cast %33 : vector<1x1x8x128xbf16> to vector<8x128xbf16>
    %35 = vector.shape_cast %32 : vector<8x128xbf16> to vector<1x1x8x128xbf16>
    tpu.vector_store %arg7[%c0_15, %c0_16, %c0_17, %c0_18], %35 {strides = array<i32>} : memref<1x4x8x128xbf16, #tpu.memory_space<vmem>>, vector<1x1x8x128xbf16>,
    %36 = vector.extract_strided_slice %29 {offsets = [0, 32], sizes = [128, 8], strides = [1, 1]} : vector<128x64xf32> to vector<128x8xf32>
    %37 = arith.truncf %36 : vector<128x8xf32> to vector<128x8xbf16>
    %c0_19 = arith.constant 0 : index
    %c0_20 = arith.constant 0 : index
    %c0_21 = arith.constant 0 : index
    %c0_22 = arith.constant 0 : index
    %38 = vector.load %arg8[%c0_19, %c0_20, %c0_21, %c0_22] : memref<1x4x128x8xbf16, #tpu.memory_space<vmem>>, vector<1x1x128x8xbf16>
    %39 = vector.shape_cast %38 : vector<1x1x128x8xbf16> to vector<128x8xbf16>
    %40 = vector.shape_cast %37 : vector<128x8xbf16> to vector<1x1x128x8xbf16>
    tpu.vector_store %arg8[%c0_19, %c0_20, %c0_21, %c0_22], %40 {strides = array<i32>} : memref<1x4x128x8xbf16, #tpu.memory_space<vmem>>, vector<1x1x128x8xbf16>,
    %41 = vector.extract_strided_slice %29 {offsets = [0, 8], sizes = [128, 8], strides = [1, 1]} : vector<128x64xf32> to vector<128x8xf32>
    %42 = tpu.transpose %41, [1, 0] : vector<128x8xf32> -> vector<8x128xf32>
    %43 = arith.truncf %42 : vector<8x128xf32> to vector<8x128xbf16>
    %c0_23 = arith.constant 0 : index
    %c1 = arith.constant 1 : index
    %c0_24 = arith.constant 0 : index
    %c0_25 = arith.constant 0 : index
    %44 = vector.load %arg7[%c0_23, %c1, %c0_24, %c0_25] : memref<1x4x8x128xbf16, #tpu.memory_space<vmem>>, vector<1x1x8x128xbf16>
    %45 = vector.shape_cast %44 : vector<1x1x8x128xbf16> to vector<8x128xbf16>
    %46 = vector.shape_cast %43 : vector<8x128xbf16> to vector<1x1x8x128xbf16>
    tpu.vector_store %arg7[%c0_23, %c1, %c0_24, %c0_25], %46 {strides = array<i32>} : memref<1x4x8x128xbf16, #tpu.memory_space<vmem>>, vector<1x1x8x128xbf16>,
    %47 = vector.extract_strided_slice %29 {offsets = [0, 40], sizes = [128, 8], strides = [1, 1]} : vector<128x64xf32> to vector<128x8xf32>
    %48 = arith.truncf %47 : vector<128x8xf32> to vector<128x8xbf16>
    %c0_26 = arith.constant 0 : index
    %c1_27 = arith.constant 1 : index
    %c0_28 = arith.constant 0 : index
    %c0_29 = arith.constant 0 : index
    %49 = vector.load %arg8[%c0_26, %c1_27, %c0_28, %c0_29] : memref<1x4x128x8xbf16, #tpu.memory_space<vmem>>, vector<1x1x128x8xbf16>
    %50 = vector.shape_cast %49 : vector<1x1x128x8xbf16> to vector<128x8xbf16>
    %51 = vector.shape_cast %48 : vector<128x8xbf16> to vector<1x1x128x8xbf16>
    tpu.vector_store %arg8[%c0_26, %c1_27, %c0_28, %c0_29], %51 {strides = array<i32>} : memref<1x4x128x8xbf16, #tpu.memory_space<vmem>>, vector<1x1x128x8xbf16>,
    %52 = vector.extract_strided_slice %29 {offsets = [0, 16], sizes = [128, 8], strides = [1, 1]} : vector<128x64xf32> to vector<128x8xf32>
    %53 = tpu.transpose %52, [1, 0] : vector<128x8xf32> -> vector<8x128xf32>
    %54 = arith.truncf %53 : vector<8x128xf32> to vector<8x128xbf16>
    %c0_30 = arith.constant 0 : index
    %c2 = arith.constant 2 : index
    %c0_31 = arith.constant 0 : index
    %c0_32 = arith.constant 0 : index
    %55 = vector.load %arg7[%c0_30, %c2, %c0_31, %c0_32] : memref<1x4x8x128xbf16, #tpu.memory_space<vmem>>, vector<1x1x8x128xbf16>
    %56 = vector.shape_cast %55 : vector<1x1x8x128xbf16> to vector<8x128xbf16>
    %57 = vector.shape_cast %54 : vector<8x128xbf16> to vector<1x1x8x128xbf16>
    tpu.vector_store %arg7[%c0_30, %c2, %c0_31, %c0_32], %57 {strides = array<i32>} : memref<1x4x8x128xbf16, #tpu.memory_space<vmem>>, vector<1x1x8x128xbf16>,
    %58 = vector.extract_strided_slice %29 {offsets = [0, 48], sizes = [128, 8], strides = [1, 1]} : vector<128x64xf32> to vector<128x8xf32>
    %59 = arith.truncf %58 : vector<128x8xf32> to vector<128x8xbf16>
    %c0_33 = arith.constant 0 : index
    %c2_34 = arith.constant 2 : index
    %c0_35 = arith.constant 0 : index
    %c0_36 = arith.constant 0 : index
    %60 = vector.load %arg8[%c0_33, %c2_34, %c0_35, %c0_36] : memref<1x4x128x8xbf16, #tpu.memory_space<vmem>>, vector<1x1x128x8xbf16>
    %61 = vector.shape_cast %60 : vector<1x1x128x8xbf16> to vector<128x8xbf16>
    %62 = vector.shape_cast %59 : vector<128x8xbf16> to vector<1x1x128x8xbf16>
    tpu.vector_store %arg8[%c0_33, %c2_34, %c0_35, %c0_36], %62 {strides = array<i32>} : memref<1x4x128x8xbf16, #tpu.memory_space<vmem>>, vector<1x1x128x8xbf16>,
    %63 = vector.extract_strided_slice %29 {offsets = [0, 24], sizes = [128, 8], strides = [1, 1]} : vector<128x64xf32> to vector<128x8xf32>
    %64 = tpu.transpose %63, [1, 0] : vector<128x8xf32> -> vector<8x128xf32>
    %65 = arith.truncf %64 : vector<8x128xf32> to vector<8x128xbf16>
    %c0_37 = arith.constant 0 : index
    %c3 = arith.constant 3 : index
    %c0_38 = arith.constant 0 : index
    %c0_39 = arith.constant 0 : index
    %66 = vector.load %arg7[%c0_37, %c3, %c0_38, %c0_39] : memref<1x4x8x128xbf16, #tpu.memory_space<vmem>>, vector<1x1x8x128xbf16>
    %67 = vector.shape_cast %66 : vector<1x1x8x128xbf16> to vector<8x128xbf16>
    %68 = vector.shape_cast %65 : vector<8x128xbf16> to vector<1x1x8x128xbf16>
    tpu.vector_store %arg7[%c0_37, %c3, %c0_38, %c0_39], %68 {strides = array<i32>} : memref<1x4x8x128xbf16, #tpu.memory_space<vmem>>, vector<1x1x8x128xbf16>,
    %69 = vector.extract_strided_slice %29 {offsets = [0, 56], sizes = [128, 8], strides = [1, 1]} : vector<128x64xf32> to vector<128x8xf32>
    %70 = arith.truncf %69 : vector<128x8xf32> to vector<128x8xbf16>
    %c0_40 = arith.constant 0 : index
    %c3_41 = arith.constant 3 : index
    %c0_42 = arith.constant 0 : index
    %c0_43 = arith.constant 0 : index
    %71 = vector.load %arg8[%c0_40, %c3_41, %c0_42, %c0_43] : memref<1x4x128x8xbf16, #tpu.memory_space<vmem>>, vector<1x1x128x8xbf16>
    %72 = vector.shape_cast %71 : vector<1x1x128x8xbf16> to vector<128x8xbf16>
    %73 = vector.shape_cast %70 : vector<128x8xbf16> to vector<1x1x128x8xbf16>
    tpu.vector_store %arg8[%c0_40, %c3_41, %c0_42, %c0_43], %73 {strides = array<i32>} : memref<1x4x128x8xbf16, #tpu.memory_space<vmem>>, vector<1x1x128x8xbf16>,
    return
  }
  func.func @transform_0(%arg0: i32, %arg1: i32) -> (i32, i32, i32) {
    %c0_i32 = arith.constant 0 : i32
    %c0_i32_0 = arith.constant 0 : i32
    return %arg0, %arg1, %c0_i32 : i32, i32, i32
  }
  func.func @transform_1(%arg0: i32, %arg1: i32) -> (i32, i32) {
    %c0_i32 = arith.constant 0 : i32
    %c0_i32_0 = arith.constant 0 : i32
    %c0_i32_1 = arith.constant 0 : i32
    return %c0_i32, %c0_i32_0 : i32, i32
  }
  func.func @transform_2(%arg0: i32, %arg1: i32) -> (i32, i32) {
    %c0_i32 = arith.constant 0 : i32
    %c0_i32_0 = arith.constant 0 : i32
    %c0_i32_1 = arith.constant 0 : i32
    return %c0_i32, %c0_i32_0 : i32, i32
  }
  func.func @transform_3(%arg0: i32, %arg1: i32) -> (i32, i32) {
    %c0_i32 = arith.constant 0 : i32
    %c0_i32_0 = arith.constant 0 : i32
    %c0_i32_1 = arith.constant 0 : i32
    return %c0_i32, %c0_i32_0 : i32, i32
  }
  func.func @transform_4(%arg0: i32, %arg1: i32) -> (i32, i32) {
    %c0_i32 = arith.constant 0 : i32
    %c0_i32_0 = arith.constant 0 : i32
    %c0_i32_1 = arith.constant 0 : i32
    return %c0_i32, %c0_i32_0 : i32, i32
  }
  func.func @transform_5(%arg0: i32, %arg1: i32) -> (i32, i32, i32, i32) {
    %c0_i32 = arith.constant 0 : i32
    %c0_i32_0 = arith.constant 0 : i32
    %c0_i32_1 = arith.constant 0 : i32
    return %arg0, %c0_i32, %c0_i32_0, %arg1 : i32, i32, i32, i32
  }
  func.func @transform_6(%arg0: i32, %arg1: i32) -> (i32, i32, i32, i32) {
    %c0_i32 = arith.constant 0 : i32
    %c0_i32_0 = arith.constant 0 : i32
    %c0_i32_1 = arith.constant 0 : i32
    return %arg0, %c0_i32, %arg1, %c0_i32_0 : i32, i32, i32, i32
  }
}

</mosaic_0001>

<bundles_post_ra>
// kernel: tpu_custom_call.1
= control target key start
LH: loop header
LB: loop body
LE: loop exit
PB: predicated region body
PF: predicated region fallthrough
CT: control target
= control target key end

     0   :  { %s3138_s0 = inlined_call_operand.vmem [shape: f32[2,256,32], index: 0, kind: input, shape index: {}]   ;;  %s3139_s1 = inlined_call_operand.vmem [shape: f32[1,32], index: 1, kind: input, shape index: {}]   ;;  %s3140_s2 = inlined_call_operand.vmem [shape: f32[1,32], index: 2, kind: input, shape index: {}]   ;;  %s3141_s3 = inlined_call_operand.vmem [shape: bf16[32,64], index: 3, kind: input, shape index: {}]   ;;  %s3142_s4 = inlined_call_operand.vmem [shape: f32[1,64], index: 4, kind: input, shape index: {}]   ;;  %s3143_s5 = inlined_call_operand.hbm [shape: bf16[2,4,8,256], index: 5, kind: output, shape index: {0}]   ;;  %s3144_s6 = inlined_call_operand.vmem [shape: bf16[2,4,256,8], index: 6, kind: output, shape index: {1}]  }
   0x1   :  { %3145 = sst [smem:[#allocation6_spill]] %s3138_s0 }
   0x2   :  { %3146 = sst [smem:[#allocation7_spill]] %s3139_s1 }
   0x3   :  { %3147 = sst [smem:[#allocation8_spill]] %s3140_s2 }
   0x4   :  { %12 = vsyncpa [#allocation3], 0 }
   0x5   :  { %14 = vsyncpa [#allocation3 + $0x1], 0  ;;  %s2278_s21 = smov 0   ;;  %s2280_s22 = smov 0  }
   0x6   :  { %s2282_s23 = smov 0   ;;  %s2284_s24 = smov 0  }
   0x7   :  { %s2286_s25 = smov 0   ;;  %s2288_s26 = smov 0  }
   0x8   :  { %s2290_s27 = smov 0   ;;  %s2292_s28 = smov 0  }
   0x9 LB: > { %s1754_s29 = sadd.s32 4294967295, %s2230_s28   ;;  %s1755_s30 = sadd.s32 4294967294, %s2230_s28   ;;  %s2230_s28 = sphi %s2292_s28, %s20_s28   ;;  %s2226_s27 = sphi %s2290_s27, %s3160_s27   ;;  %s2222_s26 = sphi %s2288_s26, %s3159_s26   ;;  %s2218_s25 = sphi %s2286_s25, %s3158_s25   ;;  %s2214_s24 = sphi %s2284_s24, %s3157_s24   ;;  %s2210_s23 = sphi %s2282_s23, %s3156_s23   ;;  %s2206_s22 = sphi %s2280_s22, %s3155_s22   ;;  %s2202_s21 = sphi %s2278_s21, %s3154_s21  }
   0xa   : > { %s29_s7 = sadd.s32 1, %s2222_s26  ;;  %s32_s8 = sadd.s32 1, %s2226_s27 }
   0xb   : > { %p30_p0 = scmp.ge.s32.totalorder %s29_s7, 2  ;;  %p163_p1 = scmp.ne.s32.totalorder %s2210_s23, %s2206_s22 }
   0xc   : > { %p164_p2 = scmp.eq.s32.totalorder %s1754_s29, 3  ;;  %p169_p5 = scmp.ne.s32.totalorder %s2206_s22, %s2202_s21 }
   0xd   : > { %s3162_s7 = smov (%p30_p0, %s29_s7), 0  ;;  %s3164_s8 = smov (!%p30_p0, %s32_s8), %s2226_s27 }
   0xe   : > { %s149_s9 = ssub.s32 %s2222_s26, %s3162_s7  ;;  %p2329_p3 = por %p164_p2, %p163_p1 }
   0xf   : > { %p34_p4 = scmp.ge.s32.totalorder %s3164_s8, 2  ;;  %p170_p6 = scmp.eq.s32.totalorder %s1755_s30, 3 }
  0x10   : > { %p1758_p7 = scmp.ge.s32.totalorder %s2230_s28, 1  ;;  %p241_p9 = scmp.lt.s32.totalorder %s2230_s28, 5 }
  0x11   : > { %s3166_s8 = smov (%p34_p4, %s3164_s8), 0  ;;  %p2338_p8 = por %p170_p6, %p169_p5 }
  0x12   : > { %s148_s12 = ssub.s32 %s2226_s27, %s3166_s8  ;;  %s153_s13 = sadd.s32 1, %s2210_s23 }
  0x13   : > { %s150_s14 = sor.u32 %s149_s9, %s148_s12  ;;  %p242_p10 = pnand %p1758_p7, %p241_p9 }
  0x14   : > { %p151_p11 = scmp.eq.s32.totalorder %s150_s14, 0  ;;  %s2350_s16 = sshll.u32 (!%p242_p10), %s2214_s24, 4 }
  0x15   : > { %245 = sbr.rel (%p242_p10) target bundleno = 1067 (0x42b), region = 40  ;;  %p280_p12 = scmp.lt.s32.totalorder (!%p242_p10), %s2218_s25, 1 }
  0x16   : > { %s2347_s15 = scalar_select %p151_p11, %s2210_s23, %s153_s13  }
  0x17   : > { %p282_p13 = scmp.lt.s32.totalorder (!%p242_p10), %s2350_s16, 31  ;;  %s3150_s0 = sld [smem:[#allocation6_spill]] (!%p242_p10) }
  0x18   : > { %s3151_s1 = sld [smem:[#allocation7_spill]] (!%p242_p10)  ;;  %s2232_s13 = smov (!%p242_p10), 88  }
  0x19   : > { %s3152_s2 = sld [smem:[#allocation8_spill]] (!%p242_p10)  ;;  %s2233_s14 = smov (!%p242_p10), 96  }
  0x1a   : > { %s281_s17 = scalar_select %p280_p12, %s2218_s25, 1  ;;  %vm309_vm0 = vcmask 261120   ;;  %vm845_vm1 = vcmask 60416  }
  0x1b   : > { %s283_s18 = scalar_select %p282_p13, %s2350_s16, 31 }
  0x1c   : > { %s1762_s19 = sshll.u32 %s281_s17, 5  ;;  %s2234_s17 = smov 80  }
  0x1d   : > { %s285_s20 = sadd.s32 %s1762_s19, %s283_s18  ;;  %s2235_s18 = smov 72  }
  0x1e   : > { %s1763_s29 = sshll.u32 %s285_s20, 3  ;;  %s2236_s19 = smov 112  }
  0x1f   : > { %s2359_s12 = scalar_lea.vmem %s3150_s0, %s1763_s29  ;;  %s2237_s20 = smov 120  }
  0x20   : > { %v291_v0 = vld [vmem:[%s2359_s12] sm:$0xff]  ;;  %v293_v1 = vld [vmem:[%s2359_s12 + $0x10] sm:$0xff]  ;;  %v292_v2 = vld [vmem:[%s2359_s12 + $0x8] sm:$0xff]  ;;  %s2238_s29 = smov 104   ;;  %s2700_s30 = sand.u32 1, %s2206_s22  }
  0x21   : > { %v310_v3 = vsel %vm309_vm0, %v291_v0, 0.0  ;;  %v316_v4 = vsel %vm309_vm0, %v293_v1, 0.0  ;;  %v294_v5 = vld [vmem:[%s2359_s12 + $0x18] sm:$0xff]  ;;  %v313_v6 = vsel %vm309_vm0, %v292_v2, 0.0  ;;  %v295_v8 = vld [vmem:[%s2359_s12 + $0x20] sm:$0xff]  ;;  %v296_v9 = vld [vmem:[%s2359_s12 + $0x28] sm:$0xff] }
  0x22   : > { %311 = vadd.xlane.f32.xlu0 %v310_v3  ;;  %317 = vadd.xlane.f32.xlu1 %v316_v4  ;;  %v319_v7 = vsel %vm309_vm0, %v294_v5, 0.0  ;;  %v322_v10 = vsel %vm309_vm0, %v295_v8, 0.0  ;;  %v325_v11 = vsel %vm309_vm0, %v296_v9, 0.0  ;;  %v2374_v12 = vld [vmem:[%s2359_s12 + $0x30] sm:$0xff]  ;;  %v2377_v13 = vld [vmem:[%s2359_s12 + $0x38] sm:$0xff]  ;;  %v2384_v16 = vld [vmem:[%s2359_s12 + $0x40] sm:$0xff] }
  0x23   : > { %v328_v14 = vsel %vm309_vm0, %v2374_v12, 0.0  ;;  %v331_v15 = vsel %vm309_vm0, %v2377_v13, 0.0  ;;  %v2387_v17 = vld [vmem:[%s2359_s12 + $0x48] sm:$0xff]  ;;  %v334_v18 = vsel %vm309_vm0, %v2384_v16, 0.0  ;;  %v2394_v20 = vld [vmem:[%s2359_s12 + $0x50] sm:$0xff]  ;;  %v2397_v21 = vld [vmem:[%s2359_s12 + $0x58] sm:$0xff] }
  0x24   : > { %v337_v19 = vsel %vm309_vm0, %v2387_v17, 0.0  ;;  %v340_v22 = vsel %vm309_vm0, %v2394_v20, 0.0  ;;  %v343_v23 = vsel %vm309_vm0, %v2397_v21, 0.0  ;;  %v2404_v24 = vld [vmem:[%s2359_s12 + $0x60] sm:$0xff]  ;;  %v2407_v25 = vld [vmem:[%s2359_s12 + $0x68] sm:$0xff]  ;;  %v2414_v28 = vld [vmem:[%s2359_s12 + $0x70] sm:$0xff] }
  0x25   : > { %v346_v26 = vsel %vm309_vm0, %v2404_v24, 0.0  ;;  %v349_v27 = vsel %vm309_vm0, %v2407_v25, 0.0  ;;  %v2417_v29 = vld [vmem:[%s2359_s12 + $0x78] sm:$0xff]  ;;  %v352_v30 = vsel %vm309_vm0, %v2414_v28, 0.0  ;;  %s1760_s9 = sshll.u32 %s2700_s30, 8 }
  0x26   : > { %314 = vadd.xlane.f32.xlu0 %v313_v6  ;;  %320 = vadd.xlane.f32.xlu1 %v319_v7  ;;  %v355_v31 = vsel %vm309_vm0, %v2417_v29, 0.0  ;;  %s2720_s12 = scalar_lea.vmem [#allocation4], %s1760_s9 }
  0x2a   : > { %323 = vadd.xlane.f32.xlu0 %v322_v10  ;;  %326 = vadd.xlane.f32.xlu1 %v325_v11 }
  0x2e   : > { %329 = vadd.xlane.f32.xlu0 %v328_v14  ;;  %332 = vadd.xlane.f32.xlu1 %v331_v15 }
  0x32   : > { %335 = vadd.xlane.f32.xlu0 %v334_v18  ;;  %338 = vadd.xlane.f32.xlu1 %v337_v19 }
  0x36   : > { %341 = vadd.xlane.f32.xlu0 %v340_v22  ;;  %344 = vadd.xlane.f32.xlu1 %v343_v23 }
  0x3a   : > { %347 = vadd.xlane.f32.xlu0 %v346_v26  ;;  %350 = vadd.xlane.f32.xlu1 %v349_v27 }
  0x3e   : > { %353 = vadd.xlane.f32.xlu0 %v352_v30  ;;  %356 = vadd.xlane.f32.xlu1 %v355_v31 }
  0xab   : > { %v312_v32 = vpop.xlane.xlu0 %311  ;;  %v318_v33 = vpop.xlane.xlu1 %317 }
  0xac   : > { %v359_v34 = vmul.f32 0.03125, %v312_v32  ;;  %v361_v35 = vmul.f32 0.03125, %v318_v33 }
  0xae   : > { %v2423_v36 = vsub.f32 %v291_v0, %v359_v34  ;;  %v2425_v37 = vsub.f32 %v293_v1, %v361_v35 }
  0xaf   : > { %v315_v38 = vpop.xlane.xlu0 %314  ;;  %v321_v39 = vpop.xlane.xlu1 %320 }
  0xb0   : > { %v360_v40 = vmul.f32 0.03125, %v315_v38  ;;  %v362_v41 = vmul.f32 0.03125, %v321_v39  ;;  %v391_v42 = vmul.f32 %v2423_v36, %v2423_v36  ;;  %v393_v43 = vmul.f32 %v2425_v37, %v2425_v37 }
  0xb2   : > { %v2431_v44 = vsub.f32 %v292_v2, %v360_v40  ;;  %v2433_v45 = vsub.f32 %v294_v5, %v362_v41  ;;  %v407_v46 = vsel %vm309_vm0, %v391_v42, 0.0  ;;  %v413_v49 = vsel %vm309_vm0, %v393_v43, 0.0 }
  0xb3   : > { %408 = vadd.xlane.f32.xlu0 %v407_v46  ;;  %v324_v47 = vpop.xlane.xlu0 %323  ;;  %v327_v48 = vpop.xlane.xlu1 %326 }
  0xb4   : > { %v363_v50 = vmul.f32 0.03125, %v324_v47  ;;  %v364_v51 = vmul.f32 0.03125, %v327_v48  ;;  %v392_v52 = vmul.f32 %v2431_v44, %v2431_v44  ;;  %v394_v53 = vmul.f32 %v2433_v45, %v2433_v45 }
  0xb6   : > { %v2441_v54 = vsub.f32 %v295_v8, %v363_v50  ;;  %v2443_v55 = vsub.f32 %v296_v9, %v364_v51  ;;  %v410_v56 = vsel %vm309_vm0, %v392_v52, 0.0  ;;  %v416_v59 = vsel %vm309_vm0, %v394_v53, 0.0  ;;  %v2105_v53 = vld [vmem:[%s3141_s3] sm:$0xff]  }
  0xb7   : > { %414 = vadd.xlane.f32.xlu0 %v413_v49  ;;  %411 = vadd.xlane.f32.xlu1 %v410_v56  ;;  %v330_v57 = vpop.xlane.xlu0 %329  ;;  %v333_v58 = vpop.xlane.xlu1 %332 }
  0xb8   : > { %v365_v60 = vmul.f32 0.03125, %v330_v57  ;;  %v366_v61 = vmul.f32 0.03125, %v333_v58  ;;  %v395_v62 = vmul.f32 %v2441_v54, %v2441_v54  ;;  %v396_v63 = vmul.f32 %v2443_v55, %v2443_v55 }
  0xba   : > { %v2452_v0 = vsub.f32 %v2374_v12, %v365_v60  ;;  %v2455_v1 = vsub.f32 %v2377_v13, %v366_v61  ;;  %v419_v2 = vsel %vm309_vm0, %v395_v62, 0.0  ;;  %v422_v5 = vsel %vm309_vm0, %v396_v63, 0.0 }
  0xbb   : > { %417 = vadd.xlane.f32.xlu1 %v416_v59  ;;  %420 = vadd.xlane.f32.xlu0 %v419_v2  ;;  %v336_v3 = vpop.xlane.xlu0 %335  ;;  %v339_v4 = vpop.xlane.xlu1 %338 }
  0xbc   : > { %v367_v6 = vmul.f32 0.03125, %v336_v3  ;;  %v368_v7 = vmul.f32 0.03125, %v339_v4  ;;  %v397_v8 = vmul.f32 %v2452_v0, %v2452_v0  ;;  %v398_v9 = vmul.f32 %v2455_v1, %v2455_v1 }
  0xbe   : > { %v2464_v10 = vsub.f32 %v2384_v16, %v367_v6  ;;  %v2467_v11 = vsub.f32 %v2387_v17, %v368_v7  ;;  %v425_v12 = vsel %vm309_vm0, %v397_v8, 0.0  ;;  %v428_v15 = vsel %vm309_vm0, %v398_v9, 0.0 }
  0xbf   : > { %423 = vadd.xlane.f32.xlu1 %v422_v5  ;;  %426 = vadd.xlane.f32.xlu0 %v425_v12  ;;  %v342_v13 = vpop.xlane.xlu0 %341  ;;  %v345_v14 = vpop.xlane.xlu1 %344 }
  0xc0   : > { %v369_v18 = vmul.f32 0.03125, %v342_v13  ;;  %v370_v19 = vmul.f32 0.03125, %v345_v14  ;;  %v399_v22 = vmul.f32 %v2464_v10, %v2464_v10  ;;  %v400_v16 = vmul.f32 %v2467_v11, %v2467_v11 }
  0xc2   : > { %v2476_v23 = vsub.f32 %v2394_v20, %v369_v18  ;;  %v2479_v17 = vsub.f32 %v2397_v21, %v370_v19  ;;  %v431_v26 = vsel %vm309_vm0, %v399_v22, 0.0  ;;  %v434_v31 = vsel %vm309_vm0, %v400_v16, 0.0 }
  0xc3   : > { %429 = vadd.xlane.f32.xlu1 %v428_v15  ;;  %432 = vadd.xlane.f32.xlu0 %v431_v26  ;;  %v348_v27 = vpop.xlane.xlu0 %347  ;;  %v351_v30 = vpop.xlane.xlu1 %350 }
  0xc4   : > { %v371_v32 = vmul.f32 0.03125, %v348_v27  ;;  %v372_v33 = vmul.f32 0.03125, %v351_v30  ;;  %v401_v34 = vmul.f32 %v2476_v23, %v2476_v23  ;;  %v402_v20 = vmul.f32 %v2479_v17, %v2479_v17 }
  0xc6   : > { %v2488_v35 = vsub.f32 %v2404_v24, %v371_v32  ;;  %v2491_v21 = vsub.f32 %v2407_v25, %v372_v33  ;;  %v437_v38 = vsel %vm309_vm0, %v401_v34, 0.0  ;;  %v440_v41 = vsel %vm309_vm0, %v402_v20, 0.0  ;;  %v2522_v32 = vld [vmem:[%s3151_s1] ss:$0 sm:$0xff] }
  0xc7   : > { %435 = vadd.xlane.f32.xlu1 %v434_v31  ;;  %438 = vadd.xlane.f32.xlu0 %v437_v38  ;;  %v354_v39 = vpop.xlane.xlu0 %353  ;;  %v357_v40 = vpop.xlane.xlu1 %356 }
  0xc8   : > { %v373_v42 = vmul.f32 0.03125, %v354_v39  ;;  %v374_v43 = vmul.f32 0.03125, %v357_v40  ;;  %v403_v46 = vmul.f32 %v2488_v35, %v2488_v35  ;;  %v404_v24 = vmul.f32 %v2491_v21, %v2491_v21 }
  0xca   : > { %v2500_v47 = vsub.f32 %v2414_v28, %v373_v42  ;;  %v2503_v25 = vsub.f32 %v2417_v29, %v374_v43  ;;  %v443_v48 = vsel %vm309_vm0, %v403_v46, 0.0  ;;  %v446_v49 = vsel %vm309_vm0, %v404_v24, 0.0  ;;  %v2104_v29 = vld [vmem:[%s3141_s3 + $0x8] sm:$0xff]   ;;  %v2529_v24 = vld [vmem:[%s3152_s2] ss:$0 sm:$0xff] }
  0xcb   : > { %441 = vadd.xlane.f32.xlu1 %v440_v41  ;;  %444 = vadd.xlane.f32.xlu0 %v443_v48 }
  0xcc   : > { %v405_v50 = vmul.f32 %v2500_v47, %v2500_v47  ;;  %v406_v51 = vmul.f32 %v2503_v25, %v2503_v25  ;;  %1879 = vmatprep.subr.bf16.mxu0 %v2104_v29  ;;  %1899 = vmatprep.subr.bf16.mxu1 %v2104_v29 }
  0xcd   : > { %1880 = vmatpush3.bf16.msra.mxu0 %v2104_v29  ;;  %1901 = vmatpush3.bf16.msra.mxu1 %v2104_v29 }
  0xce   : > { %v449_v52 = vsel %vm309_vm0, %v405_v50, 0.0  ;;  %v452_v28 = vsel %vm309_vm0, %v406_v51, 0.0  ;;  %1881 = vmatprep.subr.bf16.mxu0 %v2105_v53  ;;  %1900 = vmatprep.subr.bf16.mxu1 %v2105_v53 }
  0xcf   : > { %447 = vadd.xlane.f32.xlu1 %v446_v49  ;;  %450 = vadd.xlane.f32.xlu0 %v449_v52 }
  0xd1   : > { %1882 = vmatpush3.bf16.msra.mxu0 %v2105_v53  ;;  %1902 = vmatpush3.bf16.msra.mxu1 %v2105_v53 }
  0xd3   : > { %453 = vadd.xlane.f32.xlu1 %v452_v28 }
 0x13c   : > { %v409_v56 = vpop.xlane.xlu0 %408 }
 0x13d   : > { %v455_v57 = vmul.f32 0.03125, %v409_v56 }
 0x13f   : > { %v471_v58 = vadd.f32 1e-05, %v455_v57 }
 0x140   : > { %v412_v59 = vpop.xlane.xlu1 %411  ;;  %v415_v60 = vpop.xlane.xlu0 %414 }
 0x141   : > { %2106 = vrsqrt.f32 %v471_v58  ;;  %v456_v61 = vmul.f32 0.03125, %v412_v59  ;;  %v457_v62 = vmul.f32 0.03125, %v415_v60 }
 0x143   : > { %v472_v63 = vadd.f32 1e-05, %v456_v61  ;;  %v473_v2 = vadd.f32 1e-05, %v457_v62 }
 0x144   : > { %v418_v3 = vpop.xlane.xlu1 %417  ;;  %v421_v4 = vpop.xlane.xlu0 %420 }
 0x145   : > { %2108 = vrsqrt.f32 %v472_v63  ;;  %v458_v5 = vmul.f32 0.03125, %v418_v3  ;;  %v459_v6 = vmul.f32 0.03125, %v421_v4 }
 0x146   : > { %2110 = vrsqrt.f32 %v473_v2 }
 0x147   : > { %v474_v7 = vadd.f32 1e-05, %v458_v5  ;;  %v475_v8 = vadd.f32 1e-05, %v459_v6 }
 0x148   : > { %v424_v9 = vpop.xlane.xlu1 %423  ;;  %v427_v12 = vpop.xlane.xlu0 %426 }
 0x149   : > { %2112 = vrsqrt.f32 %v474_v7  ;;  %v460_v13 = vmul.f32 0.03125, %v424_v9  ;;  %v461_v14 = vmul.f32 0.03125, %v427_v12 }
 0x14a   : > { %2114 = vrsqrt.f32 %v475_v8 }
 0x14b   : > { %v476_v15 = vadd.f32 1e-05, %v460_v13  ;;  %v477_v18 = vadd.f32 1e-05, %v461_v14 }
 0x14c   : > { %v430_v19 = vpop.xlane.xlu1 %429  ;;  %v433_v22 = vpop.xlane.xlu0 %432 }
 0x14d   : > { %2116 = vrsqrt.f32 %v476_v15  ;;  %v462_v16 = vmul.f32 0.03125, %v430_v19  ;;  %v463_v26 = vmul.f32 0.03125, %v433_v22 }
 0x14e   : > { %v2107_v27 = vpop.eup %2106  ;;  %2118 = vrsqrt.f32 %v477_v18 }
 0x14f   : > { %v478_v30 = vadd.f32 1e-05, %v462_v16  ;;  %v479_v31 = vadd.f32 1e-05, %v463_v26  ;;  %v503_v33 = vmul.f32 %v2107_v27, %v2423_v36 }
 0x150   : > { %v436_v34 = vpop.xlane.xlu1 %435  ;;  %v439_v20 = vpop.xlane.xlu0 %438 }
 0x151   : > { %2120 = vrsqrt.f32 %v478_v30  ;;  %v464_v38 = vmul.f32 0.03125, %v436_v34  ;;  %v465_v39 = vmul.f32 0.03125, %v439_v20  ;;  %v525_v41 = vmul.f32 %v2522_v32, %v503_v33 }
 0x152   : > { %v2109_v40 = vpop.eup %2108  ;;  %2122 = vrsqrt.f32 %v479_v31 }
 0x153   : > { %v2111_v42 = vpop.eup %2110  ;;  %v480_v43 = vadd.f32 1e-05, %v464_v38  ;;  %v481_v46 = vadd.f32 1e-05, %v465_v39  ;;  %v504_v48 = vmul.f32 %v2109_v40, %v2431_v44  ;;  %v547_v53 = vadd.f32 %v2529_v24, %v525_v41 }
 0x154   : > { %v442_v36 = vpop.xlane.xlu1 %441  ;;  %v445_v49 = vpop.xlane.xlu0 %444  ;;  %v505_v50 = vmul.f32 %v2111_v42, %v2425_v37 }
 0x155   : > { %2124 = vrsqrt.f32 %v480_v43  ;;  %v466_v51 = vmul.f32 0.03125, %v442_v36  ;;  %v467_v52 = vmul.f32 0.03125, %v445_v49  ;;  %v526_v28 = vmul.f32 %v2522_v32, %v504_v48 }
 0x156   : > { %v2113_v29 = vpop.eup %2112  ;;  %2126 = vrsqrt.f32 %v481_v46  ;;  %v527_v37 = vmul.f32 %v2522_v32, %v505_v50 }
 0x157   : > { %v2115_v56 = vpop.eup %2114  ;;  %v482_v57 = vadd.f32 1e-05, %v466_v51  ;;  %v483_v58 = vadd.f32 1e-05, %v467_v52  ;;  %v548_v59 = vadd.f32 %v2529_v24, %v526_v28  ;;  %v506_v44 = vmul.f32 %v2113_v29, %v2433_v45 }
 0x158   : > { %v448_v60 = vpop.xlane.xlu1 %447  ;;  %v451_v61 = vpop.xlane.xlu0 %450  ;;  %v507_v62 = vmul.f32 %v2115_v56, %v2441_v54  ;;  %v549_v54 = vadd.f32 %v2529_v24, %v527_v37 }
 0x159   : > { %2128 = vrsqrt.f32 %v482_v57  ;;  %v468_v63 = vmul.f32 0.03125, %v448_v60  ;;  %v469_v2 = vmul.f32 0.03125, %v451_v61  ;;  %v563_v3 = vpack.c.bf16 %v548_v59, %v547_v53 }
 0x15a   : > { %v2117_v4 = vpop.eup %2116  ;;  %2130 = vrsqrt.f32 %v483_v58  ;;  %v528_v5 = vmul.f32 %v2522_v32, %v506_v44  ;;  %v529_v6 = vmul.f32 %v2522_v32, %v507_v62 }
 0x15b   : > { %v2119_v7 = vpop.eup %2118  ;;  %v484_v8 = vadd.f32 1e-05, %v468_v63  ;;  %v485_v9 = vadd.f32 1e-05, %v469_v2  ;;  %1883 = vmatprep.mubr.msk.bf16.mxu0 %vm309_vm0, %v563_v3  ;;  %v508_v45 = vmul.f32 %v2117_v4, %v2443_v55  ;;  %v2588_v4 = vld [vmem:[%s3142_s4] ss:$0 sm:$0xff] }
 0x15c   : > { %v454_v12 = vpop.xlane.xlu1 %453  ;;  %v550_v13 = vadd.f32 %v2529_v24, %v528_v5  ;;  %v509_v14 = vmul.f32 %v2119_v7, %v2452_v0  ;;  %v551_v16 = vadd.f32 %v2529_v24, %v529_v6 }
 0x15d   : > { %2132 = vrsqrt.f32 %v484_v8  ;;  %v470_v15 = vmul.f32 0.03125, %v454_v12  ;;  %v530_v18 = vmul.f32 %v2522_v32, %v508_v45 }
 0x15e   : > { %v2121_v19 = vpop.eup %2120  ;;  %2134 = vrsqrt.f32 %v485_v9  ;;  %v564_v22 = vpack.c.bf16 %v550_v13, %v549_v54  ;;  %v531_v31 = vmul.f32 %v2522_v32, %v509_v14 }
 0x15f   : > { %v2123_v26 = vpop.eup %2122  ;;  %v486_v27 = vadd.f32 1e-05, %v470_v15  ;;  %v552_v55 = vadd.f32 %v2529_v24, %v530_v18  ;;  %v510_v30 = vmul.f32 %v2121_v19, %v2455_v1 }
 0x160   : > { %1884 = vmatmul.mubr.msk.bf16.vlgmr.msra.gmra.mxu0 %vm309_vm0, %v564_v22  ;;  %v511_v0 = vmul.f32 %v2123_v26, %v2464_v10  ;;  %v553_v39 = vadd.f32 %v2529_v24, %v531_v31 }
 0x161   : > { %2136 = vrsqrt.f32 %v486_v27  ;;  %v565_v33 = vpack.c.bf16 %v552_v55, %v551_v16  ;;  %v532_v34 = vmul.f32 %v2522_v32, %v510_v30 }
 0x162   : > { %v2125_v20 = vpop.eup %2124  ;;  %v533_v41 = vmul.f32 %v2522_v32, %v511_v0 }
 0x163   : > { %v2127_v38 = vpop.eup %2126  ;;  %1887 = vmatprep.mubr.msk.bf16.mxu0 %vm309_vm0, %v565_v33  ;;  %v554_v40 = vadd.f32 %v2529_v24, %v532_v34  ;;  %v512_v1 = vmul.f32 %v2125_v20, %v2467_v11 }
 0x164   : > { %v513_v42 = vmul.f32 %v2127_v38, %v2476_v23  ;;  %v555_v36 = vadd.f32 %v2529_v24, %v533_v41 }
 0x165   : > { %v566_v43 = vpack.c.bf16 %v554_v40, %v553_v39  ;;  %v534_v10 = vmul.f32 %v2522_v32, %v512_v1 }
 0x166   : > { %v2129_v46 = vpop.eup %2128  ;;  %v535_v51 = vmul.f32 %v2522_v32, %v513_v42 }
 0x167   : > { %v2131_v48 = vpop.eup %2130  ;;  %v556_v49 = vadd.f32 %v2529_v24, %v534_v10  ;;  %v514_v50 = vmul.f32 %v2129_v46, %v2479_v17 }
 0x168   : > { %1888 = vmatmul.mubr.msk.bf16.gmra.mxu0 %vm309_vm0, %v566_v43  ;;  %v515_v11 = vmul.f32 %v2131_v48, %v2488_v35  ;;  %v557_v53 = vadd.f32 %v2529_v24, %v535_v51 }
 0x169   : > { %v567_v52 = vpack.c.bf16 %v556_v49, %v555_v36  ;;  %v536_v23 = vmul.f32 %v2522_v32, %v514_v50 }
 0x16a   : > { %v2133_v28 = vpop.eup %2132  ;;  %v537_v17 = vmul.f32 %v2522_v32, %v515_v11 }
 0x16b   : > { %v2135_v29 = vpop.eup %2134  ;;  %1891 = vmatprep.mubr.msk.bf16.mxu1 %vm309_vm0, %v567_v52  ;;  %v558_v56 = vadd.f32 %v2529_v24, %v536_v23  ;;  %v516_v57 = vmul.f32 %v2133_v28, %v2491_v21 }
 0x16c   : > { %v517_v58 = vmul.f32 %v2135_v29, %v2500_v47  ;;  %v559_v60 = vadd.f32 %v2529_v24, %v537_v17 }
 0x16d   : > { %v568_v59 = vpack.c.bf16 %v558_v56, %v557_v53  ;;  %v538_v35 = vmul.f32 %v2522_v32, %v516_v57 }
 0x16e   : > { %v2137_v44 = vpop.eup %2136  ;;  %v539_v62 = vmul.f32 %v2522_v32, %v517_v58 }
 0x16f   : > { %1892 = vmatmul.mubr.msk.bf16.vlgmr.msra.gmra.mxu1 %vm309_vm0, %v568_v59  ;;  %v560_v61 = vadd.f32 %v2529_v24, %v538_v35  ;;  %v518_v37 = vmul.f32 %v2137_v44, %v2503_v25 }
 0x170   : > { %v561_v47 = vadd.f32 %v2529_v24, %v539_v62 }
 0x171   : > { %v569_v63 = vpack.c.bf16 %v560_v61, %v559_v60  ;;  %v540_v21 = vmul.f32 %v2522_v32, %v518_v37 }
 0x173   : > { %1895 = vmatprep.mubr.msk.bf16.mxu1 %vm309_vm0, %v569_v63  ;;  %v562_v2 = vadd.f32 %v2529_v24, %v540_v21 }
 0x175   : > { %v570_v3 = vpack.c.bf16 %v562_v2, %v561_v47 }
 0x177   : > { %1896 = vmatmul.mubr.msk.bf16.gmra.mxu1 %vm309_vm0, %v570_v3 }
 0x220   : > { %v1885_v25 = vpop.f32.mrf.mxu0 }
 0x221   : > { %v2591_v5 = vadd.f32 %v1885_v25, %v2588_v4 }
 0x222   : > { %v652_v8 = vpop.f32.mrf.mxu0 }
 0x223   : > { %v1855_v32 = vpack.c.bf16 %v2591_v5, %v2591_v5  ;;  %v2607_v9 = vadd.f32 %v2588_v4, %v652_v8 }
 0x224   : > { %v1886_v13 = vpop.f32.mrf.mxu0 }
 0x225   : > { %965 = vrot.lane.b32.xlu0 %v1855_v32, %s2232_s13  ;;  %801 = vrot.lane.b32.xlu1 %v1855_v32, %s2233_s14  ;;  %v1853_v54 = vpack.c.bf16 %v2607_v9, %v2607_v9  ;;  %v2619_v14 = vadd.f32 %v1886_v13, %v2588_v4 }
 0x226   : > { %v655_v27 = vpop.f32.mrf.mxu0 }
 0x227   : > { %v1994_v22 = vpack.i.bf16 %v2619_v14, %v2591_v5  ;;  %v1856_v26 = vpack.c.bf16 %v2619_v14, %v2619_v14  ;;  %v2645_v55 = vadd.f32 %v2588_v4, %v655_v27 }
 0x228   : > { %v1889_v39 = vpop.f32.mrf.mxu0 }
 0x229   : > { %v2014_v33 = vpack.i.bf16 %v2645_v55, %v2607_v9  ;;  %v1854_v20 = vpack.c.bf16 %v2645_v55, %v2645_v55  ;;  %v2679_v40 = vadd.f32 %v1889_v39, %v2588_v4 }
 0x22a   : > { %v668_v10 = vpop.f32.mrf.mxu0 }
 0x22b   : > { %v1859_v42 = vpack.c.bf16 %v2679_v40, %v2679_v40  ;;  %v2697_v46 = vadd.f32 %v2588_v4, %v668_v10 }
 0x22c   : > { %v1890_v50 = vpop.f32.mrf.mxu0 }
 0x22d   : > { %v1857_v49 = vpack.c.bf16 %v2697_v46, %v2697_v46  ;;  %v2713_v11 = vadd.f32 %v1890_v50, %v2588_v4 }
 0x22e   : > { %v671_v59 = vpop.f32.mrf.mxu0 }
 0x22f   : > { %v1893_v24 = vpop.f32.mrf.mxu1  ;;  %v2044_v56 = vpack.i.bf16 %v2713_v11, %v2679_v40  ;;  %v2740_v58 = vpack.c.bf16 %v2713_v11, %v2713_v11  ;;  %v2750_v35 = vadd.f32 %v2588_v4, %v671_v59 }
 0x230   : > { %v2598_v6 = vadd.f32 %v1893_v24, %v2588_v4 }
 0x231   : > { %v684_v45 = vpop.f32.mrf.mxu1  ;;  %v2074_v47 = vpack.i.bf16 %v2750_v35, %v2697_v46  ;;  %v1858_v8 = vpack.c.bf16 %v2750_v35, %v2750_v35 }
 0x232   : > { %v1863_v7 = vpack.c.bf16 %v2598_v6, %v2598_v6  ;;  %v2612_v12 = vadd.f32 %v2588_v4, %v684_v45 }
 0x233   : > { %v1894_v18 = vpop.f32.mrf.mxu1 }
 0x234   : > { %981 = vrot.lane.b32.xlu0 %v1863_v7, %s2232_s13  ;;  %817 = vrot.lane.b32.xlu1 %v1863_v7, %s2233_s14  ;;  %v1861_v15 = vpack.c.bf16 %v2612_v12, %v2612_v12  ;;  %v2626_v19 = vadd.f32 %v1894_v18, %v2588_v4 }
 0x235   : > { %v687_v31 = vpop.f32.mrf.mxu1 }
 0x236   : > { %v1999_v16 = vpack.i.bf16 %v2626_v19, %v2598_v6  ;;  %v1864_v30 = vpack.c.bf16 %v2626_v19, %v2626_v19  ;;  %v2652_v0 = vadd.f32 %v2588_v4, %v687_v31 }
 0x237   : > { %v1897_v1 = vpop.f32.mrf.mxu1 }
 0x238   : > { %1113 = vrot.lane.b32.xlu0 %v1855_v32, %s2234_s17  ;;  %1261 = vrot.lane.b32.xlu1 %v1855_v32, %s2235_s18  ;;  %v2019_v34 = vpack.i.bf16 %v2652_v0, %v2612_v12  ;;  %v1862_v38 = vpack.c.bf16 %v2652_v0, %v2652_v0  ;;  %v2684_v41 = vadd.f32 %v1897_v1, %v2588_v4 }
 0x239   : > { %v700_v48 = vpop.f32.mrf.mxu1 }
 0x23a   : > { %v1867_v43 = vpack.c.bf16 %v2684_v41, %v2684_v41  ;;  %v2705_v36 = vadd.f32 %v2588_v4, %v700_v48 }
 0x23b   : > { %v1898_v51 = vpop.f32.mrf.mxu1 }
 0x23c   : > { %1129 = vrot.lane.b32.xlu0 %v1863_v7, %s2234_s17  ;;  %1277 = vrot.lane.b32.xlu1 %v1863_v7, %s2235_s18  ;;  %v2716_v52 = vadd.f32 %v1898_v51, %v2588_v4  ;;  %v1865_v23 = vpack.c.bf16 %v2705_v36, %v2705_v36 }
 0x23d   : > { %v703_v37 = vpop.f32.mrf.mxu1 }
 0x23e   : > { %v2049_v53 = vpack.i.bf16 %v2716_v52, %v2684_v41  ;;  %v2754_v61 = vpack.c.bf16 %v2716_v52, %v2716_v52  ;;  %v2764_v62 = vadd.f32 %v2588_v4, %v703_v37 }
 0x240   : > { %961 = vrot.lane.b32.xlu0 %v1853_v54, %s2232_s13  ;;  %797 = vrot.lane.b32.xlu1 %v1853_v54, %s2233_s14  ;;  %v2079_v4 = vpack.i.bf16 %v2764_v62, %v2705_v36  ;;  %v1866_v13 = vpack.c.bf16 %v2764_v62, %v2764_v62 }
 0x244   : > { %977 = vrot.lane.b32.xlu0 %v1861_v15, %s2232_s13  ;;  %813 = vrot.lane.b32.xlu1 %v1861_v15, %s2233_s14 }
 0x248   : > { %1995 = vrot.lane.b32.xlu0 %v1994_v22, %s2236_s19  ;;  %1985 = vrot.lane.b32.xlu1 %v1994_v22, %s2237_s20 }
 0x24c   : > { %2000 = vrot.lane.b32.xlu0 %v1999_v16, %s2236_s19  ;;  %1990 = vrot.lane.b32.xlu1 %v1999_v16, %s2237_s20 }
 0x250   : > { %1109 = vrot.lane.b32.xlu0 %v1853_v54, %s2234_s17  ;;  %1257 = vrot.lane.b32.xlu1 %v1853_v54, %s2235_s18 }
 0x254   : > { %1125 = vrot.lane.b32.xlu0 %v1861_v15, %s2234_s17  ;;  %1273 = vrot.lane.b32.xlu1 %v1861_v15, %s2235_s18 }
 0x258   : > { %2005 = vrot.lane.b32.xlu0 %v1994_v22, %s2238_s29  ;;  %803 = vrot.lane.b32.xlu1 %v1856_v26, %s2233_s14 }
 0x25c   : > { %2010 = vrot.lane.b32.xlu0 %v1999_v16, %s2238_s29  ;;  %819 = vrot.lane.b32.xlu1 %v1864_v30, %s2233_s14 }
 0x260   : > { %967 = vrot.lane.b32.xlu0 %v1856_v26, %s2232_s13  ;;  %2015 = vrot.lane.b32.xlu1 %v2014_v33, %s2237_s20 }
 0x264   : > { %983 = vrot.lane.b32.xlu0 %v1864_v30, %s2232_s13  ;;  %2020 = vrot.lane.b32.xlu1 %v2019_v34, %s2237_s20 }
 0x268   : > { %2030 = vrot.lane.b32.xlu0 %v2019_v34, %s2236_s19  ;;  %2025 = vrot.lane.b32.xlu1 %v2014_v33, %s2236_s19 }
 0x26c   : > { %1115 = vrot.lane.b32.xlu0 %v1856_v26, %s2234_s17  ;;  %1263 = vrot.lane.b32.xlu1 %v1856_v26, %s2235_s18 }
 0x270   : > { %1131 = vrot.lane.b32.xlu0 %v1864_v30, %s2234_s17  ;;  %1279 = vrot.lane.b32.xlu1 %v1864_v30, %s2235_s18 }
 0x274   : > { %2035 = vrot.lane.b32.xlu0 %v2014_v33, %s2238_s29  ;;  %799 = vrot.lane.b32.xlu1 %v1854_v20, %s2233_s14 }
 0x278   : > { %2040 = vrot.lane.b32.xlu0 %v2019_v34, %s2238_s29  ;;  %815 = vrot.lane.b32.xlu1 %v1862_v38, %s2233_s14 }
 0x27c   : > { %963 = vrot.lane.b32.xlu0 %v1854_v20, %s2232_s13  ;;  %1259 = vrot.lane.b32.xlu1 %v1854_v20, %s2235_s18 }
 0x280   : > { %979 = vrot.lane.b32.xlu0 %v1862_v38, %s2232_s13  ;;  %1275 = vrot.lane.b32.xlu1 %v1862_v38, %s2235_s18 }
 0x284   : > { %1111 = vrot.lane.b32.xlu0 %v1854_v20, %s2234_s17  ;;  %809 = vrot.lane.b32.xlu1 %v1859_v42, %s2233_s14 }
 0x288   : > { %1127 = vrot.lane.b32.xlu0 %v1862_v38, %s2234_s17  ;;  %825 = vrot.lane.b32.xlu1 %v1867_v43, %s2233_s14 }
 0x28c   : > { %973 = vrot.lane.b32.xlu0 %v1859_v42, %s2232_s13  ;;  %1269 = vrot.lane.b32.xlu1 %v1859_v42, %s2235_s18 }
 0x290   : > { %989 = vrot.lane.b32.xlu0 %v1867_v43, %s2232_s13  ;;  %1285 = vrot.lane.b32.xlu1 %v1867_v43, %s2235_s18 }
 0x294   : > { %1121 = vrot.lane.b32.xlu0 %v1859_v42, %s2234_s17  ;;  %805 = vrot.lane.b32.xlu1 %v1857_v49, %s2233_s14 }
 0x297   : > { %v802_v28 = vpop.permute.xlu1 %801  ;;  %v966_v29 = vpop.permute.xlu0 %965 }
 0x298   : > { %848 = vst.msk [vmem:[%s2720_s12 + $0x8] sm:$0xf] %vm845_vm1, %v802_v28  ;;  %1796 = vst.msk [vmem:[%s2720_s12 + $0x48] sm:$0xf] %vm845_vm1, %v966_v29  ;;  %1137 = vrot.lane.b32.xlu0 %v1867_v43, %s2234_s17  ;;  %821 = vrot.lane.b32.xlu1 %v1865_v23, %s2233_s14 }
 0x29c   : > { %2050 = vrot.lane.b32.xlu0 %v2049_v53, %s2237_s20  ;;  %2045 = vrot.lane.b32.xlu1 %v2044_v56, %s2237_s20 }
 0x2a0   : > { %969 = vrot.lane.b32.xlu0 %v1857_v49, %s2232_s13  ;;  %1265 = vrot.lane.b32.xlu1 %v1857_v49, %s2235_s18 }
 0x2a4   : > { %985 = vrot.lane.b32.xlu0 %v1865_v23, %s2232_s13  ;;  %1281 = vrot.lane.b32.xlu1 %v1865_v23, %s2235_s18 }
 0x2a6   : > { %v818_v57 = vpop.permute.xlu1 %817  ;;  %v982_v17 = vpop.permute.xlu0 %981 }
 0x2a7   : > { %856 = vst.msk [vmem:[%s2720_s12 + $0x28] sm:$0xf] %vm845_vm1, %v818_v57  ;;  %1804 = vst.msk [vmem:[%s2720_s12 + $0x68] sm:$0xf] %vm845_vm1, %v982_v17 }
 0x2a8   : > { %2055 = vrot.lane.b32.xlu0 %v2044_v56, %s2236_s19  ;;  %811 = vrot.lane.b32.xlu1 %v2740_v58, %s2233_s14 }
 0x2aa   : > { %v1262_v44 = vpop.permute.xlu1 %1261  ;;  %v1114_v60 = vpop.permute.xlu0 %1113 }
 0x2ab   : > { %1830 = vst.msk [vmem:[%s2720_s12 + $0xc8] sm:$0xf] %vm845_vm1, %v1262_v44  ;;  %1813 = vst.msk [vmem:[%s2720_s12 + $0x88] sm:$0xf] %vm845_vm1, %v1114_v60 }
 0x2ac   : > { %2060 = vrot.lane.b32.xlu0 %v2049_v53, %s2236_s19  ;;  %827 = vrot.lane.b32.xlu1 %v2754_v61, %s2233_s14 }
 0x2ae   : > { %v1278_v63 = vpop.permute.xlu1 %1277  ;;  %v1130_v21 = vpop.permute.xlu0 %1129 }
 0x2af   : > { %1838 = vst.msk [vmem:[%s2720_s12 + $0xe8] sm:$0xf] %vm845_vm1, %v1278_v63  ;;  %1821 = vst.msk [vmem:[%s2720_s12 + $0xa8] sm:$0xf] %vm845_vm1, %v1130_v21 }
 0x2b0   : > { %1117 = vrot.lane.b32.xlu0 %v1857_v49, %s2234_s17  ;;  %2075 = vrot.lane.b32.xlu1 %v2074_v47, %s2237_s20 }
 0x2b2   : > { %v798_v2 = vpop.permute.xlu1 %797  ;;  %v962_v3 = vpop.permute.xlu0 %961 }
 0x2b3   : > { %846 = vst.msk [vmem:[%s2720_s12] sm:$0xf] %vm845_vm1, %v798_v2  ;;  %1794 = vst.msk [vmem:[%s2720_s12 + $0x40] sm:$0xf] %vm845_vm1, %v962_v3 }
 0x2b4   : > { %1133 = vrot.lane.b32.xlu0 %v1865_v23, %s2234_s17  ;;  %2080 = vrot.lane.b32.xlu1 %v2079_v4, %s2237_s20 }
 0x2b6   : > { %v814_v25 = vpop.permute.xlu1 %813  ;;  %v978_v32 = vpop.permute.xlu0 %977 }
 0x2b7   : > { %854 = vst.msk [vmem:[%s2720_s12 + $0x20] sm:$0xf] %vm845_vm1, %v814_v25  ;;  %1802 = vst.msk [vmem:[%s2720_s12 + $0x60] sm:$0xf] %vm845_vm1, %v978_v32 }
 0x2b8   : > { %2065 = vrot.lane.b32.xlu0 %v2044_v56, %s2238_s29  ;;  %1271 = vrot.lane.b32.xlu1 %v2740_v58, %s2235_s18 }
 0x2ba   : > { %v2789_v24 = vpop.permute.xlu1 %1985  ;;  %v2791_v7 = vpop.permute.xlu0 %1995 }
 0x2bb   : > { %v1987_v44 = vunpack.i.l.bf16 %v2789_v24  ;;  %v1988_v63 = vunpack.i.h.bf16 %v2789_v24 }
 0x2bc   : > { %2070 = vrot.lane.b32.xlu0 %v2049_v53, %s2238_s29  ;;  %807 = vrot.lane.b32.xlu1 %v1858_v8, %s2233_s14 }
 0x2be   : > { %v2797_v45 = vpop.permute.xlu1 %1990  ;;  %v2799_v54 = vpop.permute.xlu0 %2000 }
 0x2c0   : > { %975 = vrot.lane.b32.xlu0 %v2740_v58, %s2232_s13  ;;  %823 = vrot.lane.b32.xlu1 %v1866_v13, %s2233_s14 }
 0x2c2   : > { %v1258_v15 = vpop.permute.xlu1 %1257  ;;  %v1110_v18 = vpop.permute.xlu0 %1109 }
 0x2c3   : > { %1828 = vst.msk [vmem:[%s2720_s12 + $0xc0] sm:$0xf] %vm845_vm1, %v1258_v15  ;;  %1811 = vst.msk [vmem:[%s2720_s12 + $0x80] sm:$0xf] %vm845_vm1, %v1110_v18 }
 0x2c4   : > { %991 = vrot.lane.b32.xlu0 %v2754_v61, %s2232_s13  ;;  %1267 = vrot.lane.b32.xlu1 %v1858_v8, %s2235_s18 }
 0x2c6   : > { %v1274_v22 = vpop.permute.xlu1 %1273  ;;  %v1126_v16 = vpop.permute.xlu0 %1125 }
 0x2c7   : > { %1836 = vst.msk [vmem:[%s2720_s12 + $0xe0] sm:$0xf] %vm845_vm1, %v1274_v22  ;;  %1819 = vst.msk [vmem:[%s2720_s12 + $0xa0] sm:$0xf] %vm845_vm1, %v1126_v16 }
 0x2c8   : > { %2085 = vrot.lane.b32.xlu0 %v2074_v47, %s2236_s19  ;;  %1283 = vrot.lane.b32.xlu1 %v1866_v13, %s2235_s18 }
 0x2ca   : > { %v804_v26 = vpop.permute.xlu1 %803  ;;  %v2819_v27 = vpop.permute.xlu0 %2005 }
 0x2cb   : > { %849 = vst.msk [vmem:[%s2720_s12 + $0xc] sm:$0xf] %vm845_vm1, %v804_v26 }
 0x2cc   : > { %2090 = vrot.lane.b32.xlu0 %v2079_v4, %s2236_s19 }
 0x2ce   : > { %v820_v30 = vpop.permute.xlu1 %819  ;;  %v2824_v31 = vpop.permute.xlu0 %2010 }
 0x2cf   : > { %857 = vst.msk [vmem:[%s2720_s12 + $0x2c] sm:$0xf] %vm845_vm1, %v820_v30 }
 0x2d0   : > { %1123 = vrot.lane.b32.xlu0 %v2740_v58, %s2234_s17 }
 0x2d2   : > { %v2016_v33 = vpop.permute.xlu1 %2015  ;;  %v968_v34 = vpop.permute.xlu0 %967 }
 0x2d3   : > { %1797 = vst.msk [vmem:[%s2720_s12 + $0x4c] sm:$0xf] %vm845_vm1, %v968_v34  ;;  %v2017_v53 = vunpack.i.l.bf16 %v2016_v33  ;;  %v2018_v17 = vunpack.i.h.bf16 %v2016_v33 }
 0x2d4   : > { %1139 = vrot.lane.b32.xlu0 %v2754_v61, %s2234_s17 }
 0x2d6   : > { %v2834_v20 = vpop.permute.xlu1 %2020  ;;  %v984_v38 = vpop.permute.xlu0 %983 }
 0x2d7   : > { %1805 = vst.msk [vmem:[%s2720_s12 + $0x6c] sm:$0xf] %vm845_vm1, %v984_v38 }
 0x2d8   : > { %2095 = vrot.lane.b32.xlu0 %v2074_v47, %s2238_s29 }
 0x2da   : > { %v2839_v39 = vpop.permute.xlu1 %2025  ;;  %v2841_v1 = vpop.permute.xlu0 %2030 }
 0x2dc   : > { %2100 = vrot.lane.b32.xlu0 %v2079_v4, %s2238_s29 }
 0x2de   : > { %v1264_v42 = vpop.permute.xlu1 %1263  ;;  %v1116_v43 = vpop.permute.xlu0 %1115 }
 0x2df   : > { %1831 = vst.msk [vmem:[%s2720_s12 + $0xcc] sm:$0xf] %vm845_vm1, %v1264_v42  ;;  %1814 = vst.msk [vmem:[%s2720_s12 + $0x8c] sm:$0xf] %vm845_vm1, %v1116_v43 }
 0x2e0   : > { %971 = vrot.lane.b32.xlu0 %v1858_v8, %s2232_s13 }
 0x2e2   : > { %v1280_v10 = vpop.permute.xlu1 %1279  ;;  %v1132_v48 = vpop.permute.xlu0 %1131 }
 0x2e3   : > { %1839 = vst.msk [vmem:[%s2720_s12 + $0xec] sm:$0xf] %vm845_vm1, %v1280_v10  ;;  %1822 = vst.msk [vmem:[%s2720_s12 + $0xac] sm:$0xf] %vm845_vm1, %v1132_v48 }
 0x2e4   : > { %987 = vrot.lane.b32.xlu0 %v1866_v13, %s2232_s13  ;;  %s1759_s13 = sshll.u32 %s2700_s30, 4 }
 0x2e5   : > { %s272_s14 = scalar_lea.vmem [#allocation2], %s1759_s13 }
 0x2e6   : > { %v800_v49 = vpop.permute.xlu1 %799  ;;  %v2854_v50 = vpop.permute.xlu0 %2035  ;;  %s1341_s20 = sshll.u32 %s272_s14, 4  ;;  %s3005_s20 = int_to_ptr.vmem [resolvable:$true] %s1341_s20 }
 0x2e7   : > { %847 = vst.msk [vmem:[%s2720_s12 + $0x4] sm:$0xf] %vm845_vm1, %v800_v49  ;;  %v2022_v49 = vunpack.i.l.bf16 %v2834_v20  ;;  %s2138_s1 = scalar_lea.vmem %s3005_s20, 256 }
 0x2e8   : > { %1119 = vrot.lane.b32.xlu0 %v1858_v8, %s2234_s17  ;;  %p2139_p0 = scmp.ne.s32.totalorder %s3005_s20, %s2138_s1 }
 0x2ea   : > { %v816_v51 = vpop.permute.xlu1 %815  ;;  %v2859_v23 = vpop.permute.xlu0 %2040  ;;  %p2140_p1 = pnand %p2139_p0, %p2329_p3 }
 0x2eb   : > { %855 = vst.msk [vmem:[%s2720_s12 + $0x24] sm:$0xf] %vm845_vm1, %v816_v51 }
 0x2ec   : > { %1135 = vrot.lane.b32.xlu0 %v1866_v13, %s2234_s17  ;;  %s1846_s17 = sshll.u32 %s2218_s25, 3  ;;  %p2141_p2 = pneg %p2140_p1 }
 0x2ed   : > { %s1338_s19 = sadd.s32 %s2214_s24, %s1846_s17  ;;  %s2239_s24 = smov [#allocation2]  }
 0x2ee   : > { %v1260_v28 = vpop.permute.xlu1 %1259  ;;  %v964_v29 = vpop.permute.xlu0 %963  ;;  %s1847_s29 = sshll.u32 %s1338_s19, 6  ;;  %s2142_s17 = sshll.u32 %s2239_s24, 4  ;;  %s2143_s17 = int_to_ptr.vmem [resolvable:$false] %s2142_s17 }
 0x2ef   : > { %1829 = vst.msk [vmem:[%s2720_s12 + $0xc4] sm:$0xf] %vm845_vm1, %v1260_v28  ;;  %1795 = vst.msk [vmem:[%s2720_s12 + $0x44] sm:$0xf] %vm845_vm1, %v964_v29  ;;  %v2023_v28 = vunpack.i.h.bf16 %v2834_v20  ;;  %v1993_v20 = vunpack.i.h.bf16 %v2797_v45  ;;  %s3010_s0 = scalar_lea.hbm %s3143_s5, %s1847_s29  ;;  %s2144_s19 = scalar_lea.vmem %s2143_s17, 512 }
 0x2f0   : > { %p2145_p4 = scmp.lt.s32.totalorder %s3005_s20, %s2143_s17  ;;  %p2146_p5 = scmp.lt.s32.totalorder %s2144_s19, %s2138_s1 }
 0x2f1   : > { %926 = vxpose.xlu1.b32.start [1/16] (narrow) %v2017_v53, 8  ;;  %v1992_v53 = vunpack.i.l.bf16 %v2797_v45 }
 0x2f2   : > { %v1276_v56 = vpop.permute.xlu1 %1275  ;;  %v980_v57 = vpop.permute.xlu0 %979  ;;  %p2147_p6 = por %p2146_p5, %p2145_p4 }
 0x2f3   : > { %1837 = vst.msk [vmem:[%s2720_s12 + $0xe4] sm:$0xf] %vm845_vm1, %v1276_v56  ;;  %1803 = vst.msk [vmem:[%s2720_s12 + $0x64] sm:$0xf] %vm845_vm1, %v980_v57 }
 0x2f4   : > { %p2148_p7 = pnand %p2147_p6, %p2141_p2 }
 0x2f5   : > { %927 = vxpose.xlu1.b32.cont [2/16] (narrow) %v2018_v17, 8 }
 0x2f6   : > { %v810_v58 = vpop.permute.xlu1 %809  ;;  %v1112_v59 = vpop.permute.xlu0 %1111 }
 0x2f7   : > { %852 = vst.msk [vmem:[%s2720_s12 + $0x18] sm:$0xf] %vm845_vm1, %v810_v58  ;;  %1812 = vst.msk [vmem:[%s2720_s12 + $0x84] sm:$0xf] %vm845_vm1, %v1112_v59 }
 0x2f9   : > { %928 = vxpose.xlu1.b32.cont [3/16] (narrow) %v1987_v44, 8  ;;  %v2007_v44 = vunpack.i.l.bf16 %v2819_v27 }
 0x2fa   : > { %v826_v60 = vpop.permute.xlu1 %825  ;;  %v1128_v37 = vpop.permute.xlu0 %1127 }
 0x2fb   : > { %860 = vst.msk [vmem:[%s2720_s12 + $0x38] sm:$0xf] %vm845_vm1, %v826_v60  ;;  %1820 = vst.msk [vmem:[%s2720_s12 + $0xa4] sm:$0xf] %vm845_vm1, %v1128_v37  ;;  %v2027_v37 = vunpack.i.l.bf16 %v2839_v39 }
 0x2fd   : > { %929 = vxpose.xlu1.b32.cont [4/16] (narrow) %v1988_v63, 8  ;;  %v2008_v63 = vunpack.i.h.bf16 %v2819_v27  ;;  %v1998_v27 = vunpack.i.h.bf16 %v2791_v7 }
 0x2fe   : > { %v1270_v21 = vpop.permute.xlu1 %1269  ;;  %v974_v47 = vpop.permute.xlu0 %973 }
 0x2ff   : > { %1834 = vst.msk [vmem:[%s2720_s12 + $0xd8] sm:$0xf] %vm845_vm1, %v1270_v21  ;;  %1800 = vst.msk [vmem:[%s2720_s12 + $0x58] sm:$0xf] %vm845_vm1, %v974_v47  ;;  %v2028_v21 = vunpack.i.h.bf16 %v2839_v39 }
 0x302   : > { %v1286_v2 = vpop.permute.xlu1 %1285  ;;  %v990_v3 = vpop.permute.xlu0 %989 }
 0x303   : > { %1842 = vst.msk [vmem:[%s2720_s12 + $0xf8] sm:$0xf] %vm845_vm1, %v1286_v2  ;;  %1808 = vst.msk [vmem:[%s2720_s12 + $0x78] sm:$0xf] %vm845_vm1, %v990_v3  ;;  %v1997_v3 = vunpack.i.l.bf16 %v2791_v7  ;;  %v2043_v7 = vunpack.i.h.bf16 %v2859_v23 }
 0x306   : > { %v806_v4 = vpop.permute.xlu1 %805  ;;  %v1122_v25 = vpop.permute.xlu0 %1121 }
 0x307   : > { %850 = vst.msk [vmem:[%s2720_s12 + $0x10] sm:$0xf] %vm845_vm1, %v806_v4  ;;  %1817 = vst.msk [vmem:[%s2720_s12 + $0x98] sm:$0xf] %vm845_vm1, %v1122_v25 }
 0x30a   : > { %715 = vxpose.xlu0.b32.start [1/16] (narrow) %v2607_v9, 8  ;;  %v822_v32 = vpop.permute.xlu1 %821  ;;  %v1138_v24 = vpop.permute.xlu0 %1137 }
 0x30b   : > { %858 = vst.msk [vmem:[%s2720_s12 + $0x30] sm:$0xf] %vm845_vm1, %v822_v32  ;;  %1825 = vst.msk [vmem:[%s2720_s12 + $0xb8] sm:$0xf] %vm845_vm1, %v1138_v24 }
 0x30e   : > { %716 = vxpose.xlu0.b32.cont [2/16] (narrow) %v2645_v55, 8  ;;  %v2046_v8 = vpop.permute.xlu1 %2045  ;;  %v2900_v13 = vpop.permute.xlu0 %2050 }
 0x30f   : > { %v2047_v42 = vunpack.i.l.bf16 %v2046_v8  ;;  %v2048_v10 = vunpack.i.h.bf16 %v2046_v8  ;;  %v2052_v45 = vunpack.i.l.bf16 %v2900_v13 }
 0x312   : > { %717 = vxpose.xlu0.b32.cont [3/16] (narrow) %v2591_v5, 8  ;;  %v1266_v15 = vpop.permute.xlu1 %1265  ;;  %v970_v18 = vpop.permute.xlu0 %969 }
 0x313   : > { %1832 = vst.msk [vmem:[%s2720_s12 + $0xd0] sm:$0xf] %vm845_vm1, %v1266_v15  ;;  %1798 = vst.msk [vmem:[%s2720_s12 + $0x50] sm:$0xf] %vm845_vm1, %v970_v18 }
 0x316   : > { %718 = vxpose.xlu0.b32.cont [4/16] (narrow) %v2619_v14, 8  ;;  %v1282_v9 = vpop.permute.xlu1 %1281  ;;  %v986_v22 = vpop.permute.xlu0 %985 }
 0x317   : > { %1840 = vst.msk [vmem:[%s2720_s12 + $0xf0] sm:$0xf] %vm845_vm1, %v1282_v9  ;;  %1806 = vst.msk [vmem:[%s2720_s12 + $0x70] sm:$0xf] %vm845_vm1, %v986_v22  ;;  %v2012_v9 = vunpack.i.l.bf16 %v2824_v31  ;;  %v2032_v22 = vunpack.i.l.bf16 %v2841_v1 }
 0x31a   : > { %719 = vxpose.xlu0.b32.cont [5/16] (narrow) %v2697_v46, 8  ;;  %v812_v55 = vpop.permute.xlu1 %811  ;;  %v2913_v5 = vpop.permute.xlu0 %2055 }
 0x31b   : > { %853 = vst.msk [vmem:[%s2720_s12 + $0x1c] sm:$0xf] %vm845_vm1, %v812_v55  ;;  %v2057_v15 = vunpack.i.l.bf16 %v2913_v5  ;;  %v2058_v18 = vunpack.i.h.bf16 %v2913_v5  ;;  %v2013_v55 = vunpack.i.h.bf16 %v2824_v31  ;;  %v2003_v5 = vunpack.i.h.bf16 %v2799_v54 }
 0x31e   : > { %720 = vxpose.xlu0.b32.cont [6/16] (narrow) %v2750_v35, 8  ;;  %v828_v16 = vpop.permute.xlu1 %827  ;;  %v2918_v26 = vpop.permute.xlu0 %2060 }
 0x31f   : > { %861 = vst.msk [vmem:[%s2720_s12 + $0x3c] sm:$0xf] %vm845_vm1, %v828_v16  ;;  %v2033_v16 = vunpack.i.h.bf16 %v2841_v1 }
 0x322   : > { %721 = vxpose.xlu0.b32.cont [7/16] (narrow) %v2679_v40, 8  ;;  %v2076_v14 = vpop.permute.xlu1 %2075  ;;  %v1118_v30 = vpop.permute.xlu0 %1117 }
 0x323   : > { %v2077_v33 = vunpack.i.l.bf16 %v2076_v14  ;;  %1815 = vst.msk [vmem:[%s2720_s12 + $0x90] sm:$0xf] %vm845_vm1, %v1118_v30  ;;  %v2078_v35 = vunpack.i.h.bf16 %v2076_v14 }
 0x325   : > { %930 = vxpose.xlu1.b32.cont [5/16] (narrow) %v2077_v33, 8 }
 0x326   : > { %722 = vxpose.xlu0.b32.cont [8/16] (narrow) %v2713_v11, 8  ;;  %v2081_v46 = vpop.permute.xlu1 %2080  ;;  %v1134_v34 = vpop.permute.xlu0 %1133 }
 0x327   : > { %1823 = vst.msk [vmem:[%s2720_s12 + $0xb0] sm:$0xf] %vm845_vm1, %v1134_v34  ;;  %v2082_v57 = vunpack.i.l.bf16 %v2081_v46  ;;  %v2083_v17 = vunpack.i.h.bf16 %v2081_v46 }
 0x329   : > { %931 = vxpose.xlu1.b32.cont [6/16] (narrow) %v2078_v35, 8 }
 0x32a   : > { %723 = vxpose.xlu0.b32.cont [9/16] (narrow) %v2612_v12, 8  ;;  %v1272_v40 = vpop.permute.xlu1 %1271  ;;  %v2929_v38 = vpop.permute.xlu0 %2065 }
 0x32b   : > { %1835 = vst.msk [vmem:[%s2720_s12 + $0xdc] sm:$0xf] %vm845_vm1, %v1272_v40  ;;  %v2067_v39 = vunpack.i.l.bf16 %v2929_v38  ;;  %v2068_v24 = vunpack.i.h.bf16 %v2929_v38  ;;  %v2063_v40 = vunpack.i.h.bf16 %v2918_v26 }
 0x32d   : > { %932 = vxpose.xlu1.b32.cont [7/16] (narrow) %v2047_v42, 8 }
 0x32e   : > { %724 = vxpose.xlu0.b32.cont [10/16] (narrow) %v2652_v0, 8  ;;  %v808_v11 = vpop.permute.xlu1 %807  ;;  %v2934_v43 = vpop.permute.xlu0 %2070 }
 0x32f   : > { %851 = vst.msk [vmem:[%s2720_s12 + $0x14] sm:$0xf] %vm845_vm1, %v808_v11  ;;  %v2072_v33 = vunpack.i.l.bf16 %v2934_v43  ;;  %v2073_v46 = vunpack.i.h.bf16 %v2934_v43 }
 0x331   : > { %933 = vxpose.xlu1.b32.cont [8/16] (narrow) %v2048_v10, 8 }
 0x332   : > { %725 = vxpose.xlu0.b32.cont [11/16] (narrow) %v2598_v6, 8  ;;  %v824_v12 = vpop.permute.xlu1 %823  ;;  %v976_v48 = vpop.permute.xlu0 %975 }
 0x333   : > { %859 = vst.msk [vmem:[%s2720_s12 + $0x34] sm:$0xf] %vm845_vm1, %v824_v12  ;;  %1801 = vst.msk [vmem:[%s2720_s12 + $0x5c] sm:$0xf] %vm845_vm1, %v976_v48 }
 0x335   : > { %934 = vxpose.xlu1.b32.cont [9/16] (narrow) %v2022_v49, 8 }
 0x336   : > { %726 = vxpose.xlu0.b32.cont [12/16] (narrow) %v2626_v19, 8  ;;  %v1268_v0 = vpop.permute.xlu1 %1267  ;;  %v992_v51 = vpop.permute.xlu0 %991 }
 0x337   : > { %1833 = vst.msk [vmem:[%s2720_s12 + $0xd4] sm:$0xf] %vm845_vm1, %v1268_v0  ;;  %1809 = vst.msk [vmem:[%s2720_s12 + $0x7c] sm:$0xf] %vm845_vm1, %v992_v51 }
 0x339   : > { %935 = vxpose.xlu1.b32.cont [10/16] (narrow) %v2023_v28, 8 }
 0x33a   : > { %727 = vxpose.xlu0.b32.cont [13/16] (narrow) %v2705_v36, 8  ;;  %v1284_v6 = vpop.permute.xlu1 %1283  ;;  %v2086_v29 = vpop.permute.xlu0 %2085 }
 0x33b   : > { %1841 = vst.msk [vmem:[%s2720_s12 + $0xf4] sm:$0xf] %vm845_vm1, %v1284_v6  ;;  %v2087_v32 = vunpack.i.l.bf16 %v2086_v29  ;;  %v2088_v8 = vunpack.i.h.bf16 %v2086_v29 }
 0x33d   : > { %936 = vxpose.xlu1.b32.cont [11/16] (narrow) %v1992_v53, 8 }
 0x33e   : > { %728 = vxpose.xlu0.b32.cont [14/16] (narrow) %v2764_v62, 8  ;;  %v2955_v19 = vpop.permute.xlu0 %2090  ;;  %v2037_v62 = vunpack.i.l.bf16 %v2854_v50 }
 0x33f   : > { %v2092_v31 = vunpack.i.l.bf16 %v2955_v19  ;;  %v2093_v34 = vunpack.i.h.bf16 %v2955_v19 }
 0x341   : > { %937 = vxpose.xlu1.b32.cont [12/16] (narrow) %v1993_v20, 8 }
 0x342   : > { %729 = vxpose.xlu0.b32.cont [15/16] (narrow) %v2684_v41, 8  ;;  %v1124_v56 = vpop.permute.xlu0 %1123  ;;  %v2038_v41 = vunpack.i.h.bf16 %v2854_v50 }
 0x343   : > { %1818 = vst.msk [vmem:[%s2720_s12 + $0x9c] sm:$0xf] %vm845_vm1, %v1124_v56 }
 0x345   : > { %938 = vxpose.xlu1.b32.cont [13/16] (narrow) %v2082_v57, 8 }
 0x346   : > { %730 = vxpose.xlu0.b32.end [16/16] (narrow) %v2716_v52, 8  ;;  %v1140_v36 = vpop.permute.xlu0 %1139  ;;  %v2053_v52 = vunpack.i.h.bf16 %v2900_v13  ;;  %v2042_v13 = vunpack.i.l.bf16 %v2859_v23  ;;  %v2002_v23 = vunpack.i.l.bf16 %v2799_v54  ;;  %v2062_v54 = vunpack.i.l.bf16 %v2918_v26 }
 0x347   : > { %1826 = vst.msk [vmem:[%s2720_s12 + $0xbc] sm:$0xf] %vm845_vm1, %v1140_v36 }
 0x349   : > { %939 = vxpose.xlu1.b32.cont [14/16] (narrow) %v2083_v17, 8 }
 0x34a   : > { %v2096_v58 = vpop.permute.xlu0 %2095  ;;  %1222 = vxpose.xlu0.b32.start [1/16] (narrow) %v2037_v62, 8 }
 0x34b   : > { %v2097_v47 = vunpack.i.l.bf16 %v2096_v58  ;;  %v2098_v4 = vunpack.i.h.bf16 %v2096_v58 }
 0x34d   : > { %940 = vxpose.xlu1.b32.cont [15/16] (narrow) %v2052_v45, 8 }
 0x34e   : > { %v2101_v59 = vpop.permute.xlu0 %2100  ;;  %1223 = vxpose.xlu0.b32.cont [2/16] (narrow) %v2038_v41, 8 }
 0x34f   : > { %v2102_v14 = vunpack.i.l.bf16 %v2101_v59  ;;  %v2103_v30 = vunpack.i.h.bf16 %v2101_v59 }
 0x351   : > { %941 = vxpose.xlu1.b32.end [16/16] (narrow) %v2053_v52, 8 }
 0x352   : > { %v972_v60 = vpop.permute.xlu0 %971  ;;  %1224 = vxpose.xlu0.b32.cont [3/16] (narrow) %v2007_v44, 8 }
 0x353   : > { %1799 = vst.msk [vmem:[%s2720_s12 + $0x54] sm:$0xf] %vm845_vm1, %v972_v60 }
 0x355   : > { %1074 = vxpose.xlu1.b32.start [1/16] (narrow) %v2027_v37, 8 }
 0x356   : > { %v988_v50 = vpop.permute.xlu0 %987  ;;  %1225 = vxpose.xlu0.b32.cont [4/16] (narrow) %v2008_v63, 8 }
 0x357   : > { %1807 = vst.msk [vmem:[%s2720_s12 + $0x74] sm:$0xf] %vm845_vm1, %v988_v50 }
 0x359   : > { %1075 = vxpose.xlu1.b32.cont [2/16] (narrow) %v2028_v21, 8 }
 0x35a   : > { %v1120_v2 = vpop.permute.xlu0 %1119  ;;  %1226 = vxpose.xlu0.b32.cont [5/16] (narrow) %v2097_v47, 8 }
 0x35b   : > { %1816 = vst.msk [vmem:[%s2720_s12 + $0x94] sm:$0xf] %vm845_vm1, %v1120_v2 }
 0x35d   : > { %1076 = vxpose.xlu1.b32.cont [3/16] (narrow) %v1997_v3, 8 }
 0x35e   : > { %v1136_v25 = vpop.permute.xlu0 %1135  ;;  %1227 = vxpose.xlu0.b32.cont [6/16] (narrow) %v2098_v4, 8 }
 0x35f   : > { %1824 = vst.msk [vmem:[%s2720_s12 + $0xb4] sm:$0xf] %vm845_vm1, %v1136_v25 }
 0x361   : > { %1077 = vxpose.xlu1.b32.cont [4/16] (narrow) %v1998_v27, 8 }
 0x362   : > { %1228 = vxpose.xlu0.b32.cont [7/16] (narrow) %v2067_v39, 8 }
 0x365   : > { %1078 = vxpose.xlu1.b32.cont [5/16] (narrow) %v2087_v32, 8 }
 0x366   : > { %1229 = vxpose.xlu0.b32.cont [8/16] (narrow) %v2068_v24, 8 }
 0x369   : > { %1079 = vxpose.xlu1.b32.cont [6/16] (narrow) %v2088_v8, 8 }
 0x36a   : > { %1230 = vxpose.xlu0.b32.cont [9/16] (narrow) %v2042_v13, 8 }
 0x36d   : > { %1080 = vxpose.xlu1.b32.cont [7/16] (narrow) %v2057_v15, 8 }
 0x36e   : > { %1231 = vxpose.xlu0.b32.cont [10/16] (narrow) %v2043_v7, 8 }
 0x371   : > { %1081 = vxpose.xlu1.b32.cont [8/16] (narrow) %v2058_v18, 8 }
 0x372   : > { %1232 = vxpose.xlu0.b32.cont [11/16] (narrow) %v2012_v9, 8 }
 0x375   : > { %1082 = vxpose.xlu1.b32.cont [9/16] (narrow) %v2032_v22, 8 }
 0x376   : > { %1233 = vxpose.xlu0.b32.cont [12/16] (narrow) %v2013_v55, 8 }
 0x379   : > { %1083 = vxpose.xlu1.b32.cont [10/16] (narrow) %v2033_v16, 8 }
 0x37a   : > { %1234 = vxpose.xlu0.b32.cont [13/16] (narrow) %v2102_v14, 8 }
 0x37d   : > { %1084 = vxpose.xlu1.b32.cont [11/16] (narrow) %v2002_v23, 8 }
 0x37e   : > { %1235 = vxpose.xlu0.b32.cont [14/16] (narrow) %v2103_v30, 8 }
 0x381   : > { %1085 = vxpose.xlu1.b32.cont [12/16] (narrow) %v2003_v5, 8 }
 0x382   : > { %1236 = vxpose.xlu0.b32.cont [15/16] (narrow) %v2072_v33, 8 }
 0x385   : > { %1086 = vxpose.xlu1.b32.cont [13/16] (narrow) %v2092_v31, 8 }
 0x386   : > { %1237 = vxpose.xlu0.b32.end [16/16] (narrow) %v2073_v46, 8  ;;  %v731_v1 = vpop.trf.xlu0 }
 0x387   : > { %v747_v35 = vpack.c.bf16 %v731_v1, %v731_v1 }
 0x389   : > { %1087 = vxpose.xlu1.b32.cont [14/16] (narrow) %v2093_v34, 8  ;;  %748 = vst [vmem:[%s272_s14] sm:$0xf] %v747_v35 }
 0x38d   : > { %1088 = vxpose.xlu1.b32.cont [15/16] (narrow) %v2062_v54, 8 }
 0x391   : > { %1089 = vxpose.xlu1.b32.end [16/16] (narrow) %v2063_v40, 8  ;;  %v942_v38 = vpop.trf.xlu1 }
 0x392   : > { %v958_v42 = vpack.c.bf16 %v942_v38, %v942_v38 }
 0x394   : > { %1793 = vst [vmem:[%s272_s14 + $0x4] sm:$0xf] %v958_v42 }
 0x3af   : > { %1287 = vrot.lane.b32.xlu1 %v2754_v61, %s2235_s18 }
 0x3c6   : > { %v1238_v11 = vpop.trf.xlu0 }
 0x3c7   : > { %v1254_v43 = vpack.c.bf16 %v1238_v11, %v1238_v11 }
 0x3c9   : > { %1827 = vst [vmem:[%s272_s14 + $0xc] sm:$0xf] %v1254_v43 }
 0x3d1   : > { %v1090_v26 = vpop.trf.xlu1 }
 0x3d2   : > { %v1106_v61 = vpack.c.bf16 %v1090_v26, %v1090_v26 }
 0x3d4   : > { %1810 = vst [vmem:[%s272_s14 + $0x8] sm:$0xf] %v1106_v61 }
 0x3d5   : > { %2151 = shalt.err (!%p2148_p7)
}
 0x3d6   : > { %s2152_s14 = scalar_lea.hbm %s3010_s0, 256  ;;  %s2156_s13 = scalar_lea.hbm %s3143_s5, 1024 }
 0x3d7   : > { %p2153_p9 = scmp.ne.s32.totalorder %s3010_s0, %s2152_s14  ;;  %p2157_p12 = scmp.lt.s32.totalorder %s3010_s0, %s3143_s5 }
 0x3d8   : > { %p2158_p13 = scmp.lt.s32.totalorder %s2156_s13, %s2152_s14 }
 0x3d9   : > { %p2154_p10 = pnand %p2153_p9, %p2329_p3 }
 0x3da   : > { %p2159_p0 = por %p2158_p13, %p2157_p12 }
 0x3db   : > { %p2155_p11 = pneg %p2154_p10 }
 0x3dd   : > { %p2160_p1 = pnand %p2159_p0, %p2155_p11 }
 0x3df   : > { %2163 = shalt.err (!%p2160_p1)
}
 0x3e0   : > { %s2240_s1 = smov 64   ;;  %s2241_s17 = smov 128   ;;  %v1372_v12 = vld [vmem:[%s2720_s12] sm:$0xff] (%p2329_p3)   ;;  %v1376_v48 = vld [vmem:[%s2720_s12 + $0x8] sm:$0xff] (%p2329_p3)   ;;  %v1380_v49 = vld [vmem:[%s2720_s12 + $0x10] sm:$0xff] (%p2329_p3)  }
 0x3e1   : > { %s2242_s19 = smov 4   ;;  %s3153_s2 = scalar_lea.sflag [#allocation3], %s2700_s30  ;;  %v1384_v0 = vld [vmem:[%s2720_s12 + $0x18] sm:$0xff] (%p2329_p3)   ;;  %v1388_v51 = vld [vmem:[%s2720_s12 + $0x20] sm:$0xff] (%p2329_p3)   ;;  %v1392_v28 = vld [vmem:[%s2720_s12 + $0x28] sm:$0xff] (%p2329_p3)  }
 0x3e2   : > { %1903 = dma.vmem_to_hbm [thread:$0]  (%p2329_p3), %s3005_s20, 256, %s3010_s0, %s3153_s2, %s2240_s1, %s2241_s17, %s2242_s19  }
 0x3e3   : > { %s1849_s0 = sshll.u32 (%p2329_p3), %s2218_s25, 7  ;;  %v1396_v6 = vld [vmem:[%s2720_s12 + $0x30] sm:$0xff] (%p2329_p3)   ;;  %v1400_v29 = vld [vmem:[%s2720_s12 + $0x38] sm:$0xff] (%p2329_p3)   ;;  %v1404_v53 = vld [vmem:[%s2720_s12 + $0x40] sm:$0xff] (%p2329_p3)  }
 0x3e4   : > { %s1353_s2 = sadd.s32 (%p2329_p3), %s1849_s0, %s2350_s16  ;;  %v1408_v19 = vld [vmem:[%s2720_s12 + $0x48] sm:$0xff] (%p2329_p3)   ;;  %v1412_v20 = vld [vmem:[%s2720_s12 + $0x50] sm:$0xff] (%p2329_p3)   ;;  %v1416_v56 = vld [vmem:[%s2720_s12 + $0x58] sm:$0xff] (%p2329_p3)  }
 0x3e5   : > { %s1850_s10 = sshll.u32 (%p2329_p3), %s1353_s2, 2  ;;  %v1420_v57 = vld [vmem:[%s2720_s12 + $0x60] sm:$0xff] (%p2329_p3)   ;;  %v1424_v36 = vld [vmem:[%s2720_s12 + $0x68] sm:$0xff] (%p2329_p3)   ;;  %v1428_v17 = vld [vmem:[%s2720_s12 + $0x70] sm:$0xff] (%p2329_p3)  }
 0x3e6   : > { %s3053_s18 = scalar_lea.vmem (%p2329_p3), %s3144_s6, %s1850_s10  ;;  %v1432_v62 = vld [vmem:[%s2720_s12 + $0x78] sm:$0xff] (%p2329_p3)   ;;  %v1436_v58 = vld [vmem:[%s2720_s12 + $0x80] sm:$0xff] (%p2329_p3)   ;;  %v1440_v45 = vld [vmem:[%s2720_s12 + $0x88] sm:$0xff] (%p2329_p3)  }
 0x3e7   : > { %1373 = vst [vmem:[%s3053_s18] sm:$0xff] (%p2329_p3), %v1372_v12   ;;  %1377 = vst [vmem:[%s3053_s18 + $0x8] sm:$0xff] (%p2329_p3), %v1376_v48   ;;  %v1444_v41 = vld [vmem:[%s2720_s12 + $0x90] sm:$0xff] (%p2329_p3)   ;;  %v1448_v59 = vld [vmem:[%s2720_s12 + $0x98] sm:$0xff] (%p2329_p3)  }
 0x3e8   : > { %1381 = vst [vmem:[%s3053_s18 + $0x10] sm:$0xff] (%p2329_p3), %v1380_v49   ;;  %1385 = vst [vmem:[%s3053_s18 + $0x18] sm:$0xff] (%p2329_p3), %v1384_v0   ;;  %v1452_v52 = vld [vmem:[%s2720_s12 + $0xa0] sm:$0xff] (%p2329_p3)   ;;  %v1456_v44 = vld [vmem:[%s2720_s12 + $0xa8] sm:$0xff] (%p2329_p3)  }
 0x3e9   : > { %1389 = vst [vmem:[%s3053_s18 + $0x20] sm:$0xff] (%p2329_p3), %v1388_v51   ;;  %1393 = vst [vmem:[%s3053_s18 + $0x28] sm:$0xff] (%p2329_p3), %v1392_v28   ;;  %v1460_v60 = vld [vmem:[%s2720_s12 + $0xb0] sm:$0xff] (%p2329_p3)   ;;  %v1464_v37 = vld [vmem:[%s2720_s12 + $0xb8] sm:$0xff] (%p2329_p3)  }
 0x3ea   : > { %1397 = vst [vmem:[%s3053_s18 + $0x30] sm:$0xff] (%p2329_p3), %v1396_v6   ;;  %1401 = vst [vmem:[%s3053_s18 + $0x38] sm:$0xff] (%p2329_p3), %v1400_v29   ;;  %v1468_v63 = vld [vmem:[%s2720_s12 + $0xc0] sm:$0xff] (%p2329_p3)   ;;  %v1472_v50 = vld [vmem:[%s2720_s12 + $0xc8] sm:$0xff] (%p2329_p3)  }
 0x3eb   : > { %1405 = vst [vmem:[%s3053_s18 + $0x80] sm:$0xff] (%p2329_p3), %v1404_v53   ;;  %1409 = vst [vmem:[%s3053_s18 + $0x88] sm:$0xff] (%p2329_p3), %v1408_v19   ;;  %v1476_v21 = vld [vmem:[%s2720_s12 + $0xd0] sm:$0xff] (%p2329_p3)   ;;  %v1480_v47 = vld [vmem:[%s2720_s12 + $0xd8] sm:$0xff] (%p2329_p3)  }
 0x3ec   : > { %1413 = vst [vmem:[%s3053_s18 + $0x90] sm:$0xff] (%p2329_p3), %v1412_v20   ;;  %1417 = vst [vmem:[%s3053_s18 + $0x98] sm:$0xff] (%p2329_p3), %v1416_v56   ;;  %v1484_v2 = vld [vmem:[%s2720_s12 + $0xe0] sm:$0xff] (%p2329_p3)   ;;  %v1488_v3 = vld [vmem:[%s2720_s12 + $0xe8] sm:$0xff] (%p2329_p3)  }
 0x3ed   : > { %1421 = vst [vmem:[%s3053_s18 + $0xa0] sm:$0xff] (%p2329_p3), %v1420_v57   ;;  %1425 = vst [vmem:[%s3053_s18 + $0xa8] sm:$0xff] (%p2329_p3), %v1424_v36   ;;  %v1492_v4 = vld [vmem:[%s2720_s12 + $0xf0] sm:$0xff] (%p2329_p3)  }
 0x3ee   : > { %1429 = vst [vmem:[%s3053_s18 + $0xb0] sm:$0xff] (%p2329_p3), %v1428_v17   ;;  %1433 = vst [vmem:[%s3053_s18 + $0xb8] sm:$0xff] (%p2329_p3), %v1432_v62  }
 0x3ef   : > { %1437 = vst [vmem:[%s3053_s18 + $0x100] sm:$0xff] (%p2329_p3), %v1436_v58   ;;  %1441 = vst [vmem:[%s3053_s18 + $0x108] sm:$0xff] (%p2329_p3), %v1440_v45  }
 0x3f0   : > { %1445 = vst [vmem:[%s3053_s18 + $0x110] sm:$0xff] (%p2329_p3), %v1444_v41   ;;  %1449 = vst [vmem:[%s3053_s18 + $0x118] sm:$0xff] (%p2329_p3), %v1448_v59  }
 0x3f1   : > { %1453 = vst [vmem:[%s3053_s18 + $0x120] sm:$0xff] (%p2329_p3), %v1452_v52   ;;  %1457 = vst [vmem:[%s3053_s18 + $0x128] sm:$0xff] (%p2329_p3), %v1456_v44  }
 0x3f2   : > { %1461 = vst [vmem:[%s3053_s18 + $0x130] sm:$0xff] (%p2329_p3), %v1460_v60   ;;  %1465 = vst [vmem:[%s3053_s18 + $0x138] sm:$0xff] (%p2329_p3), %v1464_v37  }
 0x3f3   : > { %1469 = vst [vmem:[%s3053_s18 + $0x180] sm:$0xff] (%p2329_p3), %v1468_v63   ;;  %1473 = vst [vmem:[%s3053_s18 + $0x188] sm:$0xff] (%p2329_p3), %v1472_v50  }
 0x3f4   : > { %1477 = vst [vmem:[%s3053_s18 + $0x190] sm:$0xff] (%p2329_p3), %v1476_v21   ;;  %1481 = vst [vmem:[%s3053_s18 + $0x198] sm:$0xff] (%p2329_p3), %v1480_v47  }
 0x3f5   : > { %1485 = vst [vmem:[%s3053_s18 + $0x1a0] sm:$0xff] (%p2329_p3), %v1484_v2   ;;  %1489 = vst [vmem:[%s3053_s18 + $0x1a8] sm:$0xff] (%p2329_p3), %v1488_v3  }
 0x3f6   : > { %1493 = vst [vmem:[%s3053_s18 + $0x1b0] sm:$0xff] (%p2329_p3), %v1492_v4  }
 0x41e   : > { %1350 = sbr.rel (!%p2329_p3) target bundleno = 1067 (0x42b), region = 48 }
 0x421   : > { %v1288_v10 = vpop.permute.xlu1 %1287 }
 0x422   : > { %1843 = vst.msk [vmem:[%s2720_s12 + $0xfc] sm:$0xf] %vm845_vm1, %v1288_v10 }
 0x429   : > { %v1496_v25 = vld [vmem:[%s2720_s12 + $0xf8] sm:$0xff]  }
 0x42a   : > { %1497 = vst [vmem:[%s3053_s18 + $0x1b8] sm:$0xff] %v1496_v25  }
 0x42b PF: > { %p1909_p3 = scmp.ge.s32.totalorder %s2230_s28, 2  ;;  %s1657_s25 = sand.u32 1, %s2202_s21  }
 0x42c   : > { %s1658_s16 = scalar_lea.sflag [#allocation3], %s1657_s25 }
 0x42d   : > { %p1906_p2 = pnand %p1909_p3, %p2338_p8 }
 0x42f   : > { %p1907_p4 = pneg %p1906_p2 }
 0x431   : > { %2197 = dma.done.wait (%p1907_p4), %s1658_s16, 256  }
 0x432   : > { %2199 = vsyncadd (%p1907_p4), %s1658_s16, 4294967040  ;;  %s20_s28 = sadd.s32 1, %s2230_s28   ;;  %s3154_s21 = smov %s2206_s22 }
 0x433   : > { %p17_p5 = scmp.ge.s32.totalorder %s20_s28, 6   ;;  %s3155_s22 = smov %s2210_s23 }
 0x434   : > { %s3156_s23 = smov %s2347_s15  ;;  %s3157_s24 = smov %s2222_s26 }
 0x435   : > { %s3158_s25 = smov %s2226_s27  ;;  %s3159_s26 = smov %s3162_s7 }
 0x436   : > { %s3160_s27 = smov %s3166_s8  ;;  %19 = sbr.rel (!%p17_p5) target bundleno = 9 (0x9), region = 134 }
 0x43b   :  { %1670 = vsyncpa [#allocation3], 1 }
 0x43c   :  { %1672 = vsyncpa [#allocation3 + $0x1], 1 }

</bundles_post_ra>
